<compile_context>
chip_gen: v5e
topology: v5e:2x2
jax: 0.10.0
libtpu: 0.0.40
codegen_flags: <defaults>
</compile_context>

<pallas_src>
import numpy as np
import jax
import jax.numpy as jnp
from jax.experimental import pallas as pl
from jax.experimental.pallas import tpu as pltpu


# ------------------------------ fused kernel -------------------------------

def _make_fused_kernel(kernel_sizes, L, B, D, K, H):
    n_ks = len(kernel_sizes)
    CW = sum(kernel_sizes) * K          # packed conv width
    G = 4 * H                           # gate width per direction
    FK = 4 * K                          # fused feature width

    def kernel(x_ref, wbig_ref, whf_ref, ind_ref, insw_ref, wab_ref, w12_ref, out_ref):
        f32 = jnp.float32

        # -------- one MXU pass: conv (all sizes/shifts) + both LSTM input projections,
        # -------- biases folded through the ones column of x ------------------------
        proj = jnp.dot(x_ref[...], wbig_ref[...],
                       preferred_element_type=f32)          # (B*L, CW + 8H), f32

        # ---------------- CNN branch: shift-and-add + static max-pool ----------------
        cnn_feats = []
        col = 0
        for kk in kernel_sizes:
            T = L - kk + 1
            R = B * L - kk + 1
            # S[r] = sum_j proj[r + j, block_j]; block 0 carries the conv bias (folded
            # on the host), blocks j>0 carry zeros in their bias row.
            S = proj[0:R, col:col + K]
            for j in range(1, kk):
                S = S + proj[j:j + R, col + j * K: col + (j + 1) * K]
            col += kk * K
            # Per-batch max over the T valid positions (static slices, no select chain).
            # ReLU commutes with the positional max, so relu(max) == max(relu(conv+b)).
            pooled = jnp.concatenate(
                [jnp.max(S[b * L:b * L + T, :], axis=0, keepdims=True) for b in range(B)],
                axis=0)                                       # (B, K)
            cnn_feats.append(jnp.maximum(pooled, 0.0))
        cnn_cat = jnp.concatenate(cnn_feats, axis=1)          # (B, n_ks*K)

        # ---------------- BiLSTM branch (output at raw-view time L-1) ----------------
        whf = whf_ref[...]                                    # (H, 4H) f32, held in vregs
        whf_rows = [whf[j:j + 1, :] for j in range(H)]

        def lstm_cell(gates, c_prev):
            # 2 full-width EUP passes instead of 4 per-slice nonlinearities.
            sg = jax.nn.sigmoid(gates)                        # (B, 4H)
            tg = jnp.tanh(gates)                              # (B, 4H)
            i = sg[:, 0:H]
            f = sg[:, H:2 * H]
            o = sg[:, 3 * H:4 * H]
            g = tg[:, 2 * H:3 * H]
            c = f * c_prev + i * g
            return o * jnp.tanh(c), c

        h = jnp.zeros((B, H), f32)
        c = jnp.zeros((B, H), f32)
        for t in range(L):                                    # static unroll, static slices
            gx = proj[t * B:(t + 1) * B, CW:CW + G]           # x_view[t] @ W_ih + b (folded)
            # VPU recurrence: h @ W_hh as H lane-broadcast multiply-adds (no MXU on the
            # serial chain).
            rec = h[:, 0:1] * whf_rows[0]
            for j in range(1, H):
                rec = rec + h[:, j:j + 1] * whf_rows[j]
            h, c = lstm_cell(gx + rec, c)
        h_fwd = h

        # Reverse direction at output index L-1 only sees x_view[L-1] with zero state;
        # the (zero) h0 @ W_hh_rev term is dropped. Bias bb is folded into proj.
        gates_b = proj[(L - 1) * B:L * B, CW + G:CW + 2 * G]
        h_bwd, _ = lstm_cell(gates_b, jnp.zeros((B, H), f32))

        # F.relu on the full bilstm output commutes with slicing the last time step.
        h_last = jnp.maximum(jnp.concatenate([h_fwd, h_bwd], axis=1), 0.0)   # (B, 2H)

        # -------- fusion + collapsed fc1·fc2 classifier (lane-dense layout) ----------
        abs_alt = jnp.concatenate([cnn_cat, h_last], axis=1)                 # (B, 4K)
        ind_alt = jnp.dot(ind_ref[...], insw_ref[...],
                          preferred_element_type=f32)                        # bias folded
        wa = wab_ref[:, 0:FK]
        wi = wab_ref[:, FK:2 * FK]
        fused = wa * abs_alt + wi * ind_alt                                  # (B, 4K) f32
        out = jnp.dot(fused.astype(jnp.bfloat16), w12_ref[0:FK, :],
                      preferred_element_type=f32)
        out_ref[...] = out + w12_ref[FK:FK + 1, :].astype(f32)

    return kernel


# ----------------------------- forward wrapper -----------------------------

def mcbilstm_forward(params, abstract_tokens, indices):
    Ks = params["kernel_sizes"]
    n_ks = len(Ks)
    K = params["n_filters"]
    B, L = abstract_tokens.shape
    D = params["embedding"].shape[1]
    H = params["lstm"][1].shape[0]
    C = params["fc2_w"].shape[1]
    M = n_ks + 1                      # last dim of the (B, K, 4) fused tensor
    assert M == 4 and 2 * H == K, "module requires len(Ks)+1 == 4 and 2*H == n_filters"

    # Embedding lookup stays as a single XLA gather outside the fused kernel.
    embed = jnp.take(params["embedding"], abstract_tokens, axis=0)          # (B, L, D)
    x_flat = embed.reshape(B * L, D)
    x_aug = jnp.concatenate(
        [x_flat, jnp.ones((B * L, 1), jnp.float32)], axis=1).astype(jnp.bfloat16)

    # --- one packed weight: conv (per-shift (D,K) blocks) | W_ih fwd | W_ih bwd, with a
    # --- final "ones" row carrying bconv (shift-0 block only), bf and bb ---------------
    wif, whf, bf, wib, whb, bb = params["lstm"]   # whb unused: its h0 term is exactly 0
    wconv_blocks, brow_blocks = [], []
    for kk, (w, b) in zip(Ks, params["conv"]):
        wconv_blocks.append(
            jnp.transpose(w.reshape(kk, D, K), (1, 0, 2)).reshape(D, kk * K))
        brow_blocks.append(jnp.concatenate(
            [b.reshape(1, K), jnp.zeros((1, (kk - 1) * K), jnp.float32)], axis=1))
    w_top = jnp.concatenate(wconv_blocks + [wif, wib], axis=1)              # (D, CW+8H)
    w_bias = jnp.concatenate(
        brow_blocks + [bf.reshape(1, -1), bb.reshape(1, -1)], axis=1)       # (1, CW+8H)
    w_big = jnp.concatenate([w_top, w_bias], axis=0).astype(jnp.bfloat16)   # (D+1, CW+8H)

    # Permutation mapping the kernel's lane-dense (cnn || bilstm) feature layout onto
    # the PyTorch (B, K, 4)-flattened layout (applied to weights on the host -> exact).
    perm = np.array(
        [M * (p // n_ks) + (p % n_ks) for p in range(n_ks * K)]
        + [M * k + n_ks for k in range(K)], dtype=np.int32)
    wa_alt = params["w_abs"].reshape(B, M * K)[:, perm]
    wi_alt = params["w_indices"].reshape(B, M * K)[:, perm]
    wab_slab = jnp.concatenate([wa_alt, wi_alt], axis=1)                    # (B, 8K) f32

    insw_alt = params["ins_w"][:, perm]
    insb_alt = params["ins_b"][perm].reshape(1, M * K)
    insw_aug = jnp.concatenate([insw_alt, insb_alt], axis=0).astype(jnp.bfloat16)  # (Q+1,4K)
    ind_aug = jnp.concatenate(
        [indices, jnp.ones((B, 1), indices.dtype)], axis=1).astype(jnp.bfloat16)   # (B, Q+1)

    # Pre-multiplied classifier (no nonlinearity between fc1 and fc2); bias as extra row.
    fc1w_alt = params["fc1_w"][perm, :]
    w12 = fc1w_alt @ params["fc2_w"]                                        # (4K, C)
    b12 = params["fc1_b"] @ params["fc2_w"] + params["fc2_b"]               # (C,)
    w12_aug = jnp.concatenate([w12, b12.reshape(1, -1)], axis=0).astype(jnp.bfloat16)

    kernel = _make_fused_kernel(Ks, L, B, D, K, H)
    out = pl.pallas_call(
        kernel,
        out_shape=jax.ShapeDtypeStruct((B, C), jnp.float32),
        compiler_params=pltpu.CompilerParams(vmem_limit_bytes=32 * 1024 * 1024),
    )(x_aug, w_big, whf, ind_aug, insw_aug, wab_slab, w12_aug)
    return out


# --------------------------- pure-JAX reference ----------------------------

def mcbilstm_reference(params, abstract_tokens, indices):
    """Literal (un-fused) re-implementation of the PyTorch forward, for checking."""
    Ks = params["kernel_sizes"]
    K = params["n_filters"]
    B, L = abstract_tokens.shape
    D = params["embedding"].shape[1]
    H = params["lstm"][1].shape[0]
    embed = jnp.take(params["embedding"], abstract_tokens, axis=0)          # (B, L, D)

    cnn_feats = []
    for kk, (w, b) in zip(Ks, params["conv"]):
        T = L - kk + 1
        patches = jnp.stack(
            [embed[:, t:t + kk, :].reshape(B, kk * D) for t in range(T)], axis=1)
        y = jnp.maximum(jnp.einsum('btm,mk->btk', patches, w) + b, 0.0)
        cnn_feats.append(jnp.max(y, axis=1))
    cnn_y = jnp.concatenate(cnn_feats, axis=1).reshape(B, K, -1)            # (B, K, 3)

    wif, whf, bf, wib, whb, bb = params["lstm"]
    x = embed.reshape(L, B, D)                    # raw reshape (the .view bug)

    def cell(gates, c):
        i = jax.nn.sigmoid(gates[:, 0:H]); f = jax.nn.sigmoid(gates[:, H:2 * H])
        g = jnp.tanh(gates[:, 2 * H:3 * H]); o = jax.nn.sigmoid(gates[:, 3 * H:4 * H])
        c = f * c + i * g
        return o * jnp.tanh(c), c

    h = jnp.zeros((B, H)); c = jnp.zeros((B, H))
    for t in range(L):
        h, c = cell(x[t] @ wif + h @ whf + bf, c)
    h_fwd_last = h
    hb = jnp.zeros((B, H)); cb = jnp.zeros((B, H))
    outs_b = [None] * L
    for t in range(L - 1, -1, -1):
        hb, cb = cell(x[t] @ wib + hb @ whb + bb, cb)
        outs_b[t] = hb
    bilstm_last = jnp.maximum(
        jnp.concatenate([h_fwd_last, outs_b[L - 1]], axis=1), 0.0)          # (B, 2H)
    bilstm_y = bilstm_last[:, :, None]                                      # (B, K, 1)

    abs_feat = jnp.concatenate([cnn_y, bilstm_y], axis=2)                   # (B, K, 4)
    ind_feat = (indices @ params["ins_w"] + params["ins_b"]).reshape(B, K, 4)
    fused = params["w_abs"] * abs_feat + params["w_indices"] * ind_feat
    out = fused.reshape(B, -1)
    out = out @ params["fc1_w"] + params["fc1_b"]
    out = out @ params["fc2_w"] + params["fc2_b"]
    return out


# ------------------------- parameters (synthetic) --------------------------

def init_params(key, *, vocab, embed_dim, n_filters, kernel_sizes,
                lstm_hidden, indexs, batch_size, class_num):
    D, K, H, Q = embed_dim, n_filters, lstm_hidden, indexs
    keys = iter(jax.random.split(key, 32))

    def rnd(shape, scale=0.1):
        return scale * jax.random.normal(next(keys), shape, dtype=jnp.float32)

    return {
        "n_filters": K,
        "kernel_sizes": tuple(kernel_sizes),
        "embedding": rnd((vocab, D), 1.0),                       # nn.Embedding(W, D)
        # Conv2d(1, K, (kk, D)) weights flattened to (kk*D, K) + bias (K,)
        "conv": [(rnd((kk * D, K)), rnd((K,))) for kk in kernel_sizes],
        # bidirectional LSTM (1 layer): per direction W_ih^T:(D,4H), W_hh^T:(H,4H),
        # combined bias b_ih + b_hh:(4H,)
        "lstm": (rnd((D, 4 * H)), rnd((H, 4 * H)), rnd((4 * H,)),
                 rnd((D, 4 * H)), rnd((H, 4 * H)), rnd((4 * H,))),
        "ins_w": rnd((Q, 4 * K)),                                # Indices.fc
        "ins_b": rnd((4 * K,)),
        "w_abs": rnd((batch_size, K, 4), 1.0),
        "w_indices": rnd((batch_size, K, 4), 1.0),
        "w_claims": rnd((batch_size, K, 4), 1.0),                # unused in forward
        "fc1_w": rnd((4 * K, 2 * K)),
        "fc1_b": rnd((2 * K,)),
        "fc2_w": rnd((2 * K, class_num)),
        "fc2_b": rnd((class_num,)),
    }


# --------------------------------- main ------------------------------------

if __name__ == "__main__":
    # Small config consistent with the module's shape constraints:
    #   len(kernel_sizes) + 1 == 4  and  2 * lstm_hidden_dim == n_filters
    B, L = 4, 12             # batch_size, sequence length
    vocab, D = 50, 16        # words_dict, embed_dim
    K = 8                    # n_filters
    H = 4                    # lstm_hidden_dim
    Ks = (2, 3, 4)           # kernel_sizes
    Q = 8                    # indexs
    class_num = 3

    key = jax.random.PRNGKey(0)
    kp, ka, ki = jax.random.split(key, 3)
    params = init_params(kp, vocab=vocab, embed_dim=D, n_filters=K,
                         kernel_sizes=Ks, lstm_hidden=H, indexs=Q,
                         batch_size=B, class_num=class_num)

    abstract = jax.random.randint(ka, (B, L), 0, vocab, dtype=jnp.int32)
    indices = jax.random.normal(ki, (B, Q), dtype=jnp.float32)

    out = jax.block_until_ready(mcbilstm_forward(params, abstract, indices))
    assert out.shape == (B, class_num), out.shape

    ref = jax.block_until_ready(mcbilstm_reference(params, abstract, indices))
    err = float(jnp.max(jnp.abs(out - ref)))
    # bf16 MXU operands + pre-multiplied fc1·fc2 introduce ~1e-2-level differences,
    # well inside this tolerance.
    assert jnp.allclose(out, ref, atol=5e-2, rtol=5e-2), f"max|diff|={err}"

    print("KERNEL_OK")
</pallas_src>

<mosaic_0001>
module attributes {stable_mosaic.version = 11 : i64} {
  func.func @kernel(%arg0: memref<48x17xbf16, #tpu.memory_space<vmem>>, %arg1: memref<17x104xbf16, #tpu.memory_space<vmem>>, %arg2: memref<4x16xf32, #tpu.memory_space<vmem>>, %arg3: memref<4x9xbf16, #tpu.memory_space<vmem>>, %arg4: memref<9x32xbf16, #tpu.memory_space<vmem>>, %arg5: memref<4x64xf32, #tpu.memory_space<vmem>>, %arg6: memref<33x3xbf16, #tpu.memory_space<vmem>>, %arg7: memref<4x3xf32, #tpu.memory_space<vmem>>) attributes {dimension_semantics = [], scalar_prefetch = 0 : i64, scratch_operands = 0 : i64, tpu.core_type = #tpu.core_type<tc>} {
    %c0 = arith.constant 0 : index
    %c0_0 = arith.constant 0 : index
    %0 = vector.load %arg0[%c0, %c0_0] : memref<48x17xbf16, #tpu.memory_space<vmem>>, vector<48x17xbf16>
    %c0_1 = arith.constant 0 : index
    %c0_2 = arith.constant 0 : index
    %1 = vector.load %arg1[%c0_1, %c0_2] : memref<17x104xbf16, #tpu.memory_space<vmem>>, vector<17x104xbf16>
    %cst = arith.constant dense<0.000000e+00> : vector<48x104xf32>
    %2 = tpu.matmul %0, %1, %cst {dimension_numbers = #tpu.dot_dimension_numbers<[1], [0], [0], [1], [0, 0, 1, 1], [], []>} : vector<48x17xbf16>, vector<17x104xbf16>, vector<48x104xf32> -> vector<48x104xf32>
    %3 = vector.extract_strided_slice %2 {offsets = [0, 0], sizes = [47, 8], strides = [1, 1]} : vector<48x104xf32> to vector<47x8xf32>
    %4 = vector.extract_strided_slice %2 {offsets = [1, 8], sizes = [47, 8], strides = [1, 1]} : vector<48x104xf32> to vector<47x8xf32>
    %5 = arith.addf %3, %4 : vector<47x8xf32>
    %6 = vector.extract_strided_slice %5 {offsets = [0, 0], sizes = [11, 8], strides = [1, 1]} : vector<47x8xf32> to vector<11x8xf32>
    %cst_3 = arith.constant dense<0xFF800000> : vector<8xf32>
    %7 = vector.multi_reduction <maximumf>, %6, %cst_3 [0] : vector<11x8xf32> to vector<8xf32>
    %8 = vector.shape_cast %7 : vector<8xf32> to vector<1x8xf32>
    %9 = vector.extract_strided_slice %5 {offsets = [12, 0], sizes = [11, 8], strides = [1, 1]} : vector<47x8xf32> to vector<11x8xf32>
    %cst_4 = arith.constant dense<0xFF800000> : vector<8xf32>
    %10 = vector.multi_reduction <maximumf>, %9, %cst_4 [0] : vector<11x8xf32> to vector<8xf32>
    %11 = vector.shape_cast %10 : vector<8xf32> to vector<1x8xf32>
    %12 = vector.extract_strided_slice %5 {offsets = [24, 0], sizes = [11, 8], strides = [1, 1]} : vector<47x8xf32> to vector<11x8xf32>
    %cst_5 = arith.constant dense<0xFF800000> : vector<8xf32>
    %13 = vector.multi_reduction <maximumf>, %12, %cst_5 [0] : vector<11x8xf32> to vector<8xf32>
    %14 = vector.shape_cast %13 : vector<8xf32> to vector<1x8xf32>
    %15 = vector.extract_strided_slice %5 {offsets = [36, 0], sizes = [11, 8], strides = [1, 1]} : vector<47x8xf32> to vector<11x8xf32>
    %cst_6 = arith.constant dense<0xFF800000> : vector<8xf32>
    %16 = vector.multi_reduction <maximumf>, %15, %cst_6 [0] : vector<11x8xf32> to vector<8xf32>
    %17 = vector.shape_cast %16 : vector<8xf32> to vector<1x8xf32>
    %18 = tpu.concatenate %8, %11, %14, %17 in 0 : vector<1x8xf32>, vector<1x8xf32>, vector<1x8xf32>, vector<1x8xf32> -> vector<4x8xf32>
    %cst_7 = arith.constant 0.000000e+00 : f32
    %19 = vector.broadcast %cst_7 : f32 to vector<4x8xf32>
    %20 = arith.maximumf %18, %19 : vector<4x8xf32>
    %21 = vector.extract_strided_slice %2 {offsets = [0, 16], sizes = [46, 8], strides = [1, 1]} : vector<48x104xf32> to vector<46x8xf32>
    %22 = vector.extract_strided_slice %2 {offsets = [1, 24], sizes = [46, 8], strides = [1, 1]} : vector<48x104xf32> to vector<46x8xf32>
    %23 = arith.addf %21, %22 : vector<46x8xf32>
    %24 = vector.extract_strided_slice %2 {offsets = [2, 32], sizes = [46, 8], strides = [1, 1]} : vector<48x104xf32> to vector<46x8xf32>
    %25 = arith.addf %23, %24 : vector<46x8xf32>
    %26 = vector.extract_strided_slice %25 {offsets = [0, 0], sizes = [10, 8], strides = [1, 1]} : vector<46x8xf32> to vector<10x8xf32>
    %cst_8 = arith.constant dense<0xFF800000> : vector<8xf32>
    %27 = vector.multi_reduction <maximumf>, %26, %cst_8 [0] : vector<10x8xf32> to vector<8xf32>
    %28 = vector.shape_cast %27 : vector<8xf32> to vector<1x8xf32>
    %29 = vector.extract_strided_slice %25 {offsets = [12, 0], sizes = [10, 8], strides = [1, 1]} : vector<46x8xf32> to vector<10x8xf32>
    %cst_9 = arith.constant dense<0xFF800000> : vector<8xf32>
    %30 = vector.multi_reduction <maximumf>, %29, %cst_9 [0] : vector<10x8xf32> to vector<8xf32>
    %31 = vector.shape_cast %30 : vector<8xf32> to vector<1x8xf32>
    %32 = vector.extract_strided_slice %25 {offsets = [24, 0], sizes = [10, 8], strides = [1, 1]} : vector<46x8xf32> to vector<10x8xf32>
    %cst_10 = arith.constant dense<0xFF800000> : vector<8xf32>
    %33 = vector.multi_reduction <maximumf>, %32, %cst_10 [0] : vector<10x8xf32> to vector<8xf32>
    %34 = vector.shape_cast %33 : vector<8xf32> to vector<1x8xf32>
    %35 = vector.extract_strided_slice %25 {offsets = [36, 0], sizes = [10, 8], strides = [1, 1]} : vector<46x8xf32> to vector<10x8xf32>
    %cst_11 = arith.constant dense<0xFF800000> : vector<8xf32>
    %36 = vector.multi_reduction <maximumf>, %35, %cst_11 [0] : vector<10x8xf32> to vector<8xf32>
    %37 = vector.shape_cast %36 : vector<8xf32> to vector<1x8xf32>
    %38 = tpu.concatenate %28, %31, %34, %37 in 0 : vector<1x8xf32>, vector<1x8xf32>, vector<1x8xf32>, vector<1x8xf32> -> vector<4x8xf32>
    %cst_12 = arith.constant 0.000000e+00 : f32
    %39 = vector.broadcast %cst_12 : f32 to vector<4x8xf32>
    %40 = arith.maximumf %38, %39 : vector<4x8xf32>
    %41 = vector.extract_strided_slice %2 {offsets = [0, 40], sizes = [45, 8], strides = [1, 1]} : vector<48x104xf32> to vector<45x8xf32>
    %42 = vector.extract_strided_slice %2 {offsets = [1, 48], sizes = [45, 8], strides = [1, 1]} : vector<48x104xf32> to vector<45x8xf32>
    %43 = arith.addf %41, %42 : vector<45x8xf32>
    %44 = vector.extract_strided_slice %2 {offsets = [2, 56], sizes = [45, 8], strides = [1, 1]} : vector<48x104xf32> to vector<45x8xf32>
    %45 = arith.addf %43, %44 : vector<45x8xf32>
    %46 = vector.extract_strided_slice %2 {offsets = [3, 64], sizes = [45, 8], strides = [1, 1]} : vector<48x104xf32> to vector<45x8xf32>
    %47 = arith.addf %45, %46 : vector<45x8xf32>
    %48 = vector.extract_strided_slice %47 {offsets = [0, 0], sizes = [9, 8], strides = [1, 1]} : vector<45x8xf32> to vector<9x8xf32>
    %cst_13 = arith.constant dense<0xFF800000> : vector<8xf32>
    %49 = vector.multi_reduction <maximumf>, %48, %cst_13 [0] : vector<9x8xf32> to vector<8xf32>
    %50 = vector.shape_cast %49 : vector<8xf32> to vector<1x8xf32>
    %51 = vector.extract_strided_slice %47 {offsets = [12, 0], sizes = [9, 8], strides = [1, 1]} : vector<45x8xf32> to vector<9x8xf32>
    %cst_14 = arith.constant dense<0xFF800000> : vector<8xf32>
    %52 = vector.multi_reduction <maximumf>, %51, %cst_14 [0] : vector<9x8xf32> to vector<8xf32>
    %53 = vector.shape_cast %52 : vector<8xf32> to vector<1x8xf32>
    %54 = vector.extract_strided_slice %47 {offsets = [24, 0], sizes = [9, 8], strides = [1, 1]} : vector<45x8xf32> to vector<9x8xf32>
    %cst_15 = arith.constant dense<0xFF800000> : vector<8xf32>
    %55 = vector.multi_reduction <maximumf>, %54, %cst_15 [0] : vector<9x8xf32> to vector<8xf32>
    %56 = vector.shape_cast %55 : vector<8xf32> to vector<1x8xf32>
    %57 = vector.extract_strided_slice %47 {offsets = [36, 0], sizes = [9, 8], strides = [1, 1]} : vector<45x8xf32> to vector<9x8xf32>
    %cst_16 = arith.constant dense<0xFF800000> : vector<8xf32>
    %58 = vector.multi_reduction <maximumf>, %57, %cst_16 [0] : vector<9x8xf32> to vector<8xf32>
    %59 = vector.shape_cast %58 : vector<8xf32> to vector<1x8xf32>
    %60 = tpu.concatenate %50, %53, %56, %59 in 0 : vector<1x8xf32>, vector<1x8xf32>, vector<1x8xf32>, vector<1x8xf32> -> vector<4x8xf32>
    %cst_17 = arith.constant 0.000000e+00 : f32
    %61 = vector.broadcast %cst_17 : f32 to vector<4x8xf32>
    %62 = arith.maximumf %60, %61 : vector<4x8xf32>
    %63 = tpu.concatenate %20, %40, %62 in 1 : vector<4x8xf32>, vector<4x8xf32>, vector<4x8xf32> -> vector<4x24xf32>
    %c0_18 = arith.constant 0 : index
    %c0_19 = arith.constant 0 : index
    %64 = vector.load %arg2[%c0_18, %c0_19] : memref<4x16xf32, #tpu.memory_space<vmem>>, vector<4x16xf32>
    %65 = vector.extract_strided_slice %64 {offsets = [0, 0], sizes = [1, 16], strides = [1, 1]} : vector<4x16xf32> to vector<1x16xf32>
    %66 = vector.extract_strided_slice %64 {offsets = [1, 0], sizes = [1, 16], strides = [1, 1]} : vector<4x16xf32> to vector<1x16xf32>
    %67 = vector.extract_strided_slice %64 {offsets = [2, 0], sizes = [1, 16], strides = [1, 1]} : vector<4x16xf32> to vector<1x16xf32>
    %68 = vector.extract_strided_slice %64 {offsets = [3, 0], sizes = [1, 16], strides = [1, 1]} : vector<4x16xf32> to vector<1x16xf32>
    %cst_20 = arith.constant 0.000000e+00 : f32
    %69 = vector.broadcast %cst_20 : f32 to vector<4x4xf32>
    %cst_21 = arith.constant 0.000000e+00 : f32
    %70 = vector.broadcast %cst_21 : f32 to vector<4x4xf32>
    %71 = vector.extract_strided_slice %2 {offsets = [0, 72], sizes = [4, 16], strides = [1, 1]} : vector<48x104xf32> to vector<4x16xf32>
    %72 = vector.extract_strided_slice %69 {offsets = [0, 0], sizes = [4, 1], strides = [1, 1]} : vector<4x4xf32> to vector<4x1xf32>
    %73 = vector.broadcast %72 : vector<4x1xf32> to vector<4x16xf32>
    %74 = vector.broadcast %65 : vector<1x16xf32> to vector<4x16xf32>
    %75 = arith.mulf %73, %74 : vector<4x16xf32>
    %76 = vector.extract_strided_slice %69 {offsets = [0, 1], sizes = [4, 1], strides = [1, 1]} : vector<4x4xf32> to vector<4x1xf32>
    %77 = vector.broadcast %76 : vector<4x1xf32> to vector<4x16xf32>
    %78 = vector.broadcast %66 : vector<1x16xf32> to vector<4x16xf32>
    %79 = arith.mulf %77, %78 : vector<4x16xf32>
    %80 = arith.addf %75, %79 : vector<4x16xf32>
    %81 = vector.extract_strided_slice %69 {offsets = [0, 2], sizes = [4, 1], strides = [1, 1]} : vector<4x4xf32> to vector<4x1xf32>
    %82 = vector.broadcast %81 : vector<4x1xf32> to vector<4x16xf32>
    %83 = vector.broadcast %67 : vector<1x16xf32> to vector<4x16xf32>
    %84 = arith.mulf %82, %83 : vector<4x16xf32>
    %85 = arith.addf %80, %84 : vector<4x16xf32>
    %86 = vector.extract_strided_slice %69 {offsets = [0, 3], sizes = [4, 1], strides = [1, 1]} : vector<4x4xf32> to vector<4x1xf32>
    %87 = vector.broadcast %86 : vector<4x1xf32> to vector<4x16xf32>
    %88 = vector.broadcast %68 : vector<1x16xf32> to vector<4x16xf32>
    %89 = arith.mulf %87, %88 : vector<4x16xf32>
    %90 = arith.addf %85, %89 : vector<4x16xf32>
    %91 = arith.addf %71, %90 : vector<4x16xf32>
    %92 = arith.negf %91 : vector<4x16xf32>
    %93 = math.exp %92 : vector<4x16xf32>
    %cst_22 = arith.constant 1.000000e+00 : f32
    %94 = vector.broadcast %cst_22 : f32 to vector<4x16xf32>
    %95 = arith.addf %94, %93 : vector<4x16xf32>
    %96 = arith.divf %94, %95 : vector<4x16xf32>
    %97 = math.tanh %91 : vector<4x16xf32>
    %98 = vector.extract_strided_slice %96 {offsets = [0, 0], sizes = [4, 4], strides = [1, 1]} : vector<4x16xf32> to vector<4x4xf32>
    %99 = vector.extract_strided_slice %96 {offsets = [0, 4], sizes = [4, 4], strides = [1, 1]} : vector<4x16xf32> to vector<4x4xf32>
    %100 = vector.extract_strided_slice %96 {offsets = [0, 12], sizes = [4, 4], strides = [1, 1]} : vector<4x16xf32> to vector<4x4xf32>
    %101 = vector.extract_strided_slice %97 {offsets = [0, 8], sizes = [4, 4], strides = [1, 1]} : vector<4x16xf32> to vector<4x4xf32>
    %102 = arith.mulf %99, %70 : vector<4x4xf32>
    %103 = arith.mulf %98, %101 : vector<4x4xf32>
    %104 = arith.addf %102, %103 : vector<4x4xf32>
    %105 = math.tanh %104 : vector<4x4xf32>
    %106 = arith.mulf %100, %105 : vector<4x4xf32>
    %107 = vector.extract_strided_slice %2 {offsets = [4, 72], sizes = [4, 16], strides = [1, 1]} : vector<48x104xf32> to vector<4x16xf32>
    %108 = vector.extract_strided_slice %106 {offsets = [0, 0], sizes = [4, 1], strides = [1, 1]} : vector<4x4xf32> to vector<4x1xf32>
    %109 = vector.broadcast %108 : vector<4x1xf32> to vector<4x16xf32>
    %110 = vector.broadcast %65 : vector<1x16xf32> to vector<4x16xf32>
    %111 = arith.mulf %109, %110 : vector<4x16xf32>
    %112 = vector.extract_strided_slice %106 {offsets = [0, 1], sizes = [4, 1], strides = [1, 1]} : vector<4x4xf32> to vector<4x1xf32>
    %113 = vector.broadcast %112 : vector<4x1xf32> to vector<4x16xf32>
    %114 = vector.broadcast %66 : vector<1x16xf32> to vector<4x16xf32>
    %115 = arith.mulf %113, %114 : vector<4x16xf32>
    %116 = arith.addf %111, %115 : vector<4x16xf32>
    %117 = vector.extract_strided_slice %106 {offsets = [0, 2], sizes = [4, 1], strides = [1, 1]} : vector<4x4xf32> to vector<4x1xf32>
    %118 = vector.broadcast %117 : vector<4x1xf32> to vector<4x16xf32>
    %119 = vector.broadcast %67 : vector<1x16xf32> to vector<4x16xf32>
    %120 = arith.mulf %118, %119 : vector<4x16xf32>
    %121 = arith.addf %116, %120 : vector<4x16xf32>
    %122 = vector.extract_strided_slice %106 {offsets = [0, 3], sizes = [4, 1], strides = [1, 1]} : vector<4x4xf32> to vector<4x1xf32>
    %123 = vector.broadcast %122 : vector<4x1xf32> to vector<4x16xf32>
    %124 = vector.broadcast %68 : vector<1x16xf32> to vector<4x16xf32>
    %125 = arith.mulf %123, %124 : vector<4x16xf32>
    %126 = arith.addf %121, %125 : vector<4x16xf32>
    %127 = arith.addf %107, %126 : vector<4x16xf32>
    %128 = arith.negf %127 : vector<4x16xf32>
    %129 = math.exp %128 : vector<4x16xf32>
    %cst_23 = arith.constant 1.000000e+00 : f32
    %130 = vector.broadcast %cst_23 : f32 to vector<4x16xf32>
    %131 = arith.addf %130, %129 : vector<4x16xf32>
    %132 = arith.divf %130, %131 : vector<4x16xf32>
    %133 = math.tanh %127 : vector<4x16xf32>
    %134 = vector.extract_strided_slice %132 {offsets = [0, 0], sizes = [4, 4], strides = [1, 1]} : vector<4x16xf32> to vector<4x4xf32>
    %135 = vector.extract_strided_slice %132 {offsets = [0, 4], sizes = [4, 4], strides = [1, 1]} : vector<4x16xf32> to vector<4x4xf32>
    %136 = vector.extract_strided_slice %132 {offsets = [0, 12], sizes = [4, 4], strides = [1, 1]} : vector<4x16xf32> to vector<4x4xf32>
    %137 = vector.extract_strided_slice %133 {offsets = [0, 8], sizes = [4, 4], strides = [1, 1]} : vector<4x16xf32> to vector<4x4xf32>
    %138 = arith.mulf %135, %104 : vector<4x4xf32>
    %139 = arith.mulf %134, %137 : vector<4x4xf32>
    %140 = arith.addf %138, %139 : vector<4x4xf32>
    %141 = math.tanh %140 : vector<4x4xf32>
    %142 = arith.mulf %136, %141 : vector<4x4xf32>
    %143 = vector.extract_strided_slice %2 {offsets = [8, 72], sizes = [4, 16], strides = [1, 1]} : vector<48x104xf32> to vector<4x16xf32>
    %144 = vector.extract_strided_slice %142 {offsets = [0, 0], sizes = [4, 1], strides = [1, 1]} : vector<4x4xf32> to vector<4x1xf32>
    %145 = vector.broadcast %144 : vector<4x1xf32> to vector<4x16xf32>
    %146 = vector.broadcast %65 : vector<1x16xf32> to vector<4x16xf32>
    %147 = arith.mulf %145, %146 : vector<4x16xf32>
    %148 = vector.extract_strided_slice %142 {offsets = [0, 1], sizes = [4, 1], strides = [1, 1]} : vector<4x4xf32> to vector<4x1xf32>
    %149 = vector.broadcast %148 : vector<4x1xf32> to vector<4x16xf32>
    %150 = vector.broadcast %66 : vector<1x16xf32> to vector<4x16xf32>
    %151 = arith.mulf %149, %150 : vector<4x16xf32>
    %152 = arith.addf %147, %151 : vector<4x16xf32>
    %153 = vector.extract_strided_slice %142 {offsets = [0, 2], sizes = [4, 1], strides = [1, 1]} : vector<4x4xf32> to vector<4x1xf32>
    %154 = vector.broadcast %153 : vector<4x1xf32> to vector<4x16xf32>
    %155 = vector.broadcast %67 : vector<1x16xf32> to vector<4x16xf32>
    %156 = arith.mulf %154, %155 : vector<4x16xf32>
    %157 = arith.addf %152, %156 : vector<4x16xf32>
    %158 = vector.extract_strided_slice %142 {offsets = [0, 3], sizes = [4, 1], strides = [1, 1]} : vector<4x4xf32> to vector<4x1xf32>
    %159 = vector.broadcast %158 : vector<4x1xf32> to vector<4x16xf32>
    %160 = vector.broadcast %68 : vector<1x16xf32> to vector<4x16xf32>
    %161 = arith.mulf %159, %160 : vector<4x16xf32>
    %162 = arith.addf %157, %161 : vector<4x16xf32>
    %163 = arith.addf %143, %162 : vector<4x16xf32>
    %164 = arith.negf %163 : vector<4x16xf32>
    %165 = math.exp %164 : vector<4x16xf32>
    %cst_24 = arith.constant 1.000000e+00 : f32
    %166 = vector.broadcast %cst_24 : f32 to vector<4x16xf32>
    %167 = arith.addf %166, %165 : vector<4x16xf32>
    %168 = arith.divf %166, %167 : vector<4x16xf32>
    %169 = math.tanh %163 : vector<4x16xf32>
    %170 = vector.extract_strided_slice %168 {offsets = [0, 0], sizes = [4, 4], strides = [1, 1]} : vector<4x16xf32> to vector<4x4xf32>
    %171 = vector.extract_strided_slice %168 {offsets = [0, 4], sizes = [4, 4], strides = [1, 1]} : vector<4x16xf32> to vector<4x4xf32>
    %172 = vector.extract_strided_slice %168 {offsets = [0, 12], sizes = [4, 4], strides = [1, 1]} : vector<4x16xf32> to vector<4x4xf32>
    %173 = vector.extract_strided_slice %169 {offsets = [0, 8], sizes = [4, 4], strides = [1, 1]} : vector<4x16xf32> to vector<4x4xf32>
    %174 = arith.mulf %171, %140 : vector<4x4xf32>
    %175 = arith.mulf %170, %173 : vector<4x4xf32>
    %176 = arith.addf %174, %175 : vector<4x4xf32>
    %177 = math.tanh %176 : vector<4x4xf32>
    %178 = arith.mulf %172, %177 : vector<4x4xf32>
    %179 = vector.extract_strided_slice %2 {offsets = [12, 72], sizes = [4, 16], strides = [1, 1]} : vector<48x104xf32> to vector<4x16xf32>
    %180 = vector.extract_strided_slice %178 {offsets = [0, 0], sizes = [4, 1], strides = [1, 1]} : vector<4x4xf32> to vector<4x1xf32>
    %181 = vector.broadcast %180 : vector<4x1xf32> to vector<4x16xf32>
    %182 = vector.broadcast %65 : vector<1x16xf32> to vector<4x16xf32>
    %183 = arith.mulf %181, %182 : vector<4x16xf32>
    %184 = vector.extract_strided_slice %178 {offsets = [0, 1], sizes = [4, 1], strides = [1, 1]} : vector<4x4xf32> to vector<4x1xf32>
    %185 = vector.broadcast %184 : vector<4x1xf32> to vector<4x16xf32>
    %186 = vector.broadcast %66 : vector<1x16xf32> to vector<4x16xf32>
    %187 = arith.mulf %185, %186 : vector<4x16xf32>
    %188 = arith.addf %183, %187 : vector<4x16xf32>
    %189 = vector.extract_strided_slice %178 {offsets = [0, 2], sizes = [4, 1], strides = [1, 1]} : vector<4x4xf32> to vector<4x1xf32>
    %190 = vector.broadcast %189 : vector<4x1xf32> to vector<4x16xf32>
    %191 = vector.broadcast %67 : vector<1x16xf32> to vector<4x16xf32>
    %192 = arith.mulf %190, %191 : vector<4x16xf32>
    %193 = arith.addf %188, %192 : vector<4x16xf32>
    %194 = vector.extract_strided_slice %178 {offsets = [0, 3], sizes = [4, 1], strides = [1, 1]} : vector<4x4xf32> to vector<4x1xf32>
    %195 = vector.broadcast %194 : vector<4x1xf32> to vector<4x16xf32>
    %196 = vector.broadcast %68 : vector<1x16xf32> to vector<4x16xf32>
    %197 = arith.mulf %195, %196 : vector<4x16xf32>
    %198 = arith.addf %193, %197 : vector<4x16xf32>
    %199 = arith.addf %179, %198 : vector<4x16xf32>
    %200 = arith.negf %199 : vector<4x16xf32>
    %201 = math.exp %200 : vector<4x16xf32>
    %cst_25 = arith.constant 1.000000e+00 : f32
    %202 = vector.broadcast %cst_25 : f32 to vector<4x16xf32>
    %203 = arith.addf %202, %201 : vector<4x16xf32>
    %204 = arith.divf %202, %203 : vector<4x16xf32>
    %205 = math.tanh %199 : vector<4x16xf32>
    %206 = vector.extract_strided_slice %204 {offsets = [0, 0], sizes = [4, 4], strides = [1, 1]} : vector<4x16xf32> to vector<4x4xf32>
    %207 = vector.extract_strided_slice %204 {offsets = [0, 4], sizes = [4, 4], strides = [1, 1]} : vector<4x16xf32> to vector<4x4xf32>
    %208 = vector.extract_strided_slice %204 {offsets = [0, 12], sizes = [4, 4], strides = [1, 1]} : vector<4x16xf32> to vector<4x4xf32>
    %209 = vector.extract_strided_slice %205 {offsets = [0, 8], sizes = [4, 4], strides = [1, 1]} : vector<4x16xf32> to vector<4x4xf32>
    %210 = arith.mulf %207, %176 : vector<4x4xf32>
    %211 = arith.mulf %206, %209 : vector<4x4xf32>
    %212 = arith.addf %210, %211 : vector<4x4xf32>
    %213 = math.tanh %212 : vector<4x4xf32>
    %214 = arith.mulf %208, %213 : vector<4x4xf32>
    %215 = vector.extract_strided_slice %2 {offsets = [16, 72], sizes = [4, 16], strides = [1, 1]} : vector<48x104xf32> to vector<4x16xf32>
    %216 = vector.extract_strided_slice %214 {offsets = [0, 0], sizes = [4, 1], strides = [1, 1]} : vector<4x4xf32> to vector<4x1xf32>
    %217 = vector.broadcast %216 : vector<4x1xf32> to vector<4x16xf32>
    %218 = vector.broadcast %65 : vector<1x16xf32> to vector<4x16xf32>
    %219 = arith.mulf %217, %218 : vector<4x16xf32>
    %220 = vector.extract_strided_slice %214 {offsets = [0, 1], sizes = [4, 1], strides = [1, 1]} : vector<4x4xf32> to vector<4x1xf32>
    %221 = vector.broadcast %220 : vector<4x1xf32> to vector<4x16xf32>
    %222 = vector.broadcast %66 : vector<1x16xf32> to vector<4x16xf32>
    %223 = arith.mulf %221, %222 : vector<4x16xf32>
    %224 = arith.addf %219, %223 : vector<4x16xf32>
    %225 = vector.extract_strided_slice %214 {offsets = [0, 2], sizes = [4, 1], strides = [1, 1]} : vector<4x4xf32> to vector<4x1xf32>
    %226 = vector.broadcast %225 : vector<4x1xf32> to vector<4x16xf32>
    %227 = vector.broadcast %67 : vector<1x16xf32> to vector<4x16xf32>
    %228 = arith.mulf %226, %227 : vector<4x16xf32>
    %229 = arith.addf %224, %228 : vector<4x16xf32>
    %230 = vector.extract_strided_slice %214 {offsets = [0, 3], sizes = [4, 1], strides = [1, 1]} : vector<4x4xf32> to vector<4x1xf32>
    %231 = vector.broadcast %230 : vector<4x1xf32> to vector<4x16xf32>
    %232 = vector.broadcast %68 : vector<1x16xf32> to vector<4x16xf32>
    %233 = arith.mulf %231, %232 : vector<4x16xf32>
    %234 = arith.addf %229, %233 : vector<4x16xf32>
    %235 = arith.addf %215, %234 : vector<4x16xf32>
    %236 = arith.negf %235 : vector<4x16xf32>
    %237 = math.exp %236 : vector<4x16xf32>
    %cst_26 = arith.constant 1.000000e+00 : f32
    %238 = vector.broadcast %cst_26 : f32 to vector<4x16xf32>
    %239 = arith.addf %238, %237 : vector<4x16xf32>
    %240 = arith.divf %238, %239 : vector<4x16xf32>
    %241 = math.tanh %235 : vector<4x16xf32>
    %242 = vector.extract_strided_slice %240 {offsets = [0, 0], sizes = [4, 4], strides = [1, 1]} : vector<4x16xf32> to vector<4x4xf32>
    %243 = vector.extract_strided_slice %240 {offsets = [0, 4], sizes = [4, 4], strides = [1, 1]} : vector<4x16xf32> to vector<4x4xf32>
    %244 = vector.extract_strided_slice %240 {offsets = [0, 12], sizes = [4, 4], strides = [1, 1]} : vector<4x16xf32> to vector<4x4xf32>
    %245 = vector.extract_strided_slice %241 {offsets = [0, 8], sizes = [4, 4], strides = [1, 1]} : vector<4x16xf32> to vector<4x4xf32>
    %246 = arith.mulf %243, %212 : vector<4x4xf32>
    %247 = arith.mulf %242, %245 : vector<4x4xf32>
    %248 = arith.addf %246, %247 : vector<4x4xf32>
    %249 = math.tanh %248 : vector<4x4xf32>
    %250 = arith.mulf %244, %249 : vector<4x4xf32>
    %251 = vector.extract_strided_slice %2 {offsets = [20, 72], sizes = [4, 16], strides = [1, 1]} : vector<48x104xf32> to vector<4x16xf32>
    %252 = vector.extract_strided_slice %250 {offsets = [0, 0], sizes = [4, 1], strides = [1, 1]} : vector<4x4xf32> to vector<4x1xf32>
    %253 = vector.broadcast %252 : vector<4x1xf32> to vector<4x16xf32>
    %254 = vector.broadcast %65 : vector<1x16xf32> to vector<4x16xf32>
    %255 = arith.mulf %253, %254 : vector<4x16xf32>
    %256 = vector.extract_strided_slice %250 {offsets = [0, 1], sizes = [4, 1], strides = [1, 1]} : vector<4x4xf32> to vector<4x1xf32>
    %257 = vector.broadcast %256 : vector<4x1xf32> to vector<4x16xf32>
    %258 = vector.broadcast %66 : vector<1x16xf32> to vector<4x16xf32>
    %259 = arith.mulf %257, %258 : vector<4x16xf32>
    %260 = arith.addf %255, %259 : vector<4x16xf32>
    %261 = vector.extract_strided_slice %250 {offsets = [0, 2], sizes = [4, 1], strides = [1, 1]} : vector<4x4xf32> to vector<4x1xf32>
    %262 = vector.broadcast %261 : vector<4x1xf32> to vector<4x16xf32>
    %263 = vector.broadcast %67 : vector<1x16xf32> to vector<4x16xf32>
    %264 = arith.mulf %262, %263 : vector<4x16xf32>
    %265 = arith.addf %260, %264 : vector<4x16xf32>
    %266 = vector.extract_strided_slice %250 {offsets = [0, 3], sizes = [4, 1], strides = [1, 1]} : vector<4x4xf32> to vector<4x1xf32>
    %267 = vector.broadcast %266 : vector<4x1xf32> to vector<4x16xf32>
    %268 = vector.broadcast %68 : vector<1x16xf32> to vector<4x16xf32>
    %269 = arith.mulf %267, %268 : vector<4x16xf32>
    %270 = arith.addf %265, %269 : vector<4x16xf32>
    %271 = arith.addf %251, %270 : vector<4x16xf32>
    %272 = arith.negf %271 : vector<4x16xf32>
    %273 = math.exp %272 : vector<4x16xf32>
    %cst_27 = arith.constant 1.000000e+00 : f32
    %274 = vector.broadcast %cst_27 : f32 to vector<4x16xf32>
    %275 = arith.addf %274, %273 : vector<4x16xf32>
    %276 = arith.divf %274, %275 : vector<4x16xf32>
    %277 = math.tanh %271 : vector<4x16xf32>
    %278 = vector.extract_strided_slice %276 {offsets = [0, 0], sizes = [4, 4], strides = [1, 1]} : vector<4x16xf32> to vector<4x4xf32>
    %279 = vector.extract_strided_slice %276 {offsets = [0, 4], sizes = [4, 4], strides = [1, 1]} : vector<4x16xf32> to vector<4x4xf32>
    %280 = vector.extract_strided_slice %276 {offsets = [0, 12], sizes = [4, 4], strides = [1, 1]} : vector<4x16xf32> to vector<4x4xf32>
    %281 = vector.extract_strided_slice %277 {offsets = [0, 8], sizes = [4, 4], strides = [1, 1]} : vector<4x16xf32> to vector<4x4xf32>
    %282 = arith.mulf %279, %248 : vector<4x4xf32>
    %283 = arith.mulf %278, %281 : vector<4x4xf32>
    %284 = arith.addf %282, %283 : vector<4x4xf32>
    %285 = math.tanh %284 : vector<4x4xf32>
    %286 = arith.mulf %280, %285 : vector<4x4xf32>
    %287 = vector.extract_strided_slice %2 {offsets = [24, 72], sizes = [4, 16], strides = [1, 1]} : vector<48x104xf32> to vector<4x16xf32>
    %288 = vector.extract_strided_slice %286 {offsets = [0, 0], sizes = [4, 1], strides = [1, 1]} : vector<4x4xf32> to vector<4x1xf32>
    %289 = vector.broadcast %288 : vector<4x1xf32> to vector<4x16xf32>
    %290 = vector.broadcast %65 : vector<1x16xf32> to vector<4x16xf32>
    %291 = arith.mulf %289, %290 : vector<4x16xf32>
    %292 = vector.extract_strided_slice %286 {offsets = [0, 1], sizes = [4, 1], strides = [1, 1]} : vector<4x4xf32> to vector<4x1xf32>
    %293 = vector.broadcast %292 : vector<4x1xf32> to vector<4x16xf32>
    %294 = vector.broadcast %66 : vector<1x16xf32> to vector<4x16xf32>
    %295 = arith.mulf %293, %294 : vector<4x16xf32>
    %296 = arith.addf %291, %295 : vector<4x16xf32>
    %297 = vector.extract_strided_slice %286 {offsets = [0, 2], sizes = [4, 1], strides = [1, 1]} : vector<4x4xf32> to vector<4x1xf32>
    %298 = vector.broadcast %297 : vector<4x1xf32> to vector<4x16xf32>
    %299 = vector.broadcast %67 : vector<1x16xf32> to vector<4x16xf32>
    %300 = arith.mulf %298, %299 : vector<4x16xf32>
    %301 = arith.addf %296, %300 : vector<4x16xf32>
    %302 = vector.extract_strided_slice %286 {offsets = [0, 3], sizes = [4, 1], strides = [1, 1]} : vector<4x4xf32> to vector<4x1xf32>
    %303 = vector.broadcast %302 : vector<4x1xf32> to vector<4x16xf32>
    %304 = vector.broadcast %68 : vector<1x16xf32> to vector<4x16xf32>
    %305 = arith.mulf %303, %304 : vector<4x16xf32>
    %306 = arith.addf %301, %305 : vector<4x16xf32>
    %307 = arith.addf %287, %306 : vector<4x16xf32>
    %308 = arith.negf %307 : vector<4x16xf32>
    %309 = math.exp %308 : vector<4x16xf32>
    %cst_28 = arith.constant 1.000000e+00 : f32
    %310 = vector.broadcast %cst_28 : f32 to vector<4x16xf32>
    %311 = arith.addf %310, %309 : vector<4x16xf32>
    %312 = arith.divf %310, %311 : vector<4x16xf32>
    %313 = math.tanh %307 : vector<4x16xf32>
    %314 = vector.extract_strided_slice %312 {offsets = [0, 0], sizes = [4, 4], strides = [1, 1]} : vector<4x16xf32> to vector<4x4xf32>
    %315 = vector.extract_strided_slice %312 {offsets = [0, 4], sizes = [4, 4], strides = [1, 1]} : vector<4x16xf32> to vector<4x4xf32>
    %316 = vector.extract_strided_slice %312 {offsets = [0, 12], sizes = [4, 4], strides = [1, 1]} : vector<4x16xf32> to vector<4x4xf32>
    %317 = vector.extract_strided_slice %313 {offsets = [0, 8], sizes = [4, 4], strides = [1, 1]} : vector<4x16xf32> to vector<4x4xf32>
    %318 = arith.mulf %315, %284 : vector<4x4xf32>
    %319 = arith.mulf %314, %317 : vector<4x4xf32>
    %320 = arith.addf %318, %319 : vector<4x4xf32>
    %321 = math.tanh %320 : vector<4x4xf32>
    %322 = arith.mulf %316, %321 : vector<4x4xf32>
    %323 = vector.extract_strided_slice %2 {offsets = [28, 72], sizes = [4, 16], strides = [1, 1]} : vector<48x104xf32> to vector<4x16xf32>
    %324 = vector.extract_strided_slice %322 {offsets = [0, 0], sizes = [4, 1], strides = [1, 1]} : vector<4x4xf32> to vector<4x1xf32>
    %325 = vector.broadcast %324 : vector<4x1xf32> to vector<4x16xf32>
    %326 = vector.broadcast %65 : vector<1x16xf32> to vector<4x16xf32>
    %327 = arith.mulf %325, %326 : vector<4x16xf32>
    %328 = vector.extract_strided_slice %322 {offsets = [0, 1], sizes = [4, 1], strides = [1, 1]} : vector<4x4xf32> to vector<4x1xf32>
    %329 = vector.broadcast %328 : vector<4x1xf32> to vector<4x16xf32>
    %330 = vector.broadcast %66 : vector<1x16xf32> to vector<4x16xf32>
    %331 = arith.mulf %329, %330 : vector<4x16xf32>
    %332 = arith.addf %327, %331 : vector<4x16xf32>
    %333 = vector.extract_strided_slice %322 {offsets = [0, 2], sizes = [4, 1], strides = [1, 1]} : vector<4x4xf32> to vector<4x1xf32>
    %334 = vector.broadcast %333 : vector<4x1xf32> to vector<4x16xf32>
    %335 = vector.broadcast %67 : vector<1x16xf32> to vector<4x16xf32>
    %336 = arith.mulf %334, %335 : vector<4x16xf32>
    %337 = arith.addf %332, %336 : vector<4x16xf32>
    %338 = vector.extract_strided_slice %322 {offsets = [0, 3], sizes = [4, 1], strides = [1, 1]} : vector<4x4xf32> to vector<4x1xf32>
    %339 = vector.broadcast %338 : vector<4x1xf32> to vector<4x16xf32>
    %340 = vector.broadcast %68 : vector<1x16xf32> to vector<4x16xf32>
    %341 = arith.mulf %339, %340 : vector<4x16xf32>
    %342 = arith.addf %337, %341 : vector<4x16xf32>
    %343 = arith.addf %323, %342 : vector<4x16xf32>
    %344 = arith.negf %343 : vector<4x16xf32>
    %345 = math.exp %344 : vector<4x16xf32>
    %cst_29 = arith.constant 1.000000e+00 : f32
    %346 = vector.broadcast %cst_29 : f32 to vector<4x16xf32>
    %347 = arith.addf %346, %345 : vector<4x16xf32>
    %348 = arith.divf %346, %347 : vector<4x16xf32>
    %349 = math.tanh %343 : vector<4x16xf32>
    %350 = vector.extract_strided_slice %348 {offsets = [0, 0], sizes = [4, 4], strides = [1, 1]} : vector<4x16xf32> to vector<4x4xf32>
    %351 = vector.extract_strided_slice %348 {offsets = [0, 4], sizes = [4, 4], strides = [1, 1]} : vector<4x16xf32> to vector<4x4xf32>
    %352 = vector.extract_strided_slice %348 {offsets = [0, 12], sizes = [4, 4], strides = [1, 1]} : vector<4x16xf32> to vector<4x4xf32>
    %353 = vector.extract_strided_slice %349 {offsets = [0, 8], sizes = [4, 4], strides = [1, 1]} : vector<4x16xf32> to vector<4x4xf32>
    %354 = arith.mulf %351, %320 : vector<4x4xf32>
    %355 = arith.mulf %350, %353 : vector<4x4xf32>
    %356 = arith.addf %354, %355 : vector<4x4xf32>
    %357 = math.tanh %356 : vector<4x4xf32>
    %358 = arith.mulf %352, %357 : vector<4x4xf32>
    %359 = vector.extract_strided_slice %2 {offsets = [32, 72], sizes = [4, 16], strides = [1, 1]} : vector<48x104xf32> to vector<4x16xf32>
    %360 = vector.extract_strided_slice %358 {offsets = [0, 0], sizes = [4, 1], strides = [1, 1]} : vector<4x4xf32> to vector<4x1xf32>
    %361 = vector.broadcast %360 : vector<4x1xf32> to vector<4x16xf32>
    %362 = vector.broadcast %65 : vector<1x16xf32> to vector<4x16xf32>
    %363 = arith.mulf %361, %362 : vector<4x16xf32>
    %364 = vector.extract_strided_slice %358 {offsets = [0, 1], sizes = [4, 1], strides = [1, 1]} : vector<4x4xf32> to vector<4x1xf32>
    %365 = vector.broadcast %364 : vector<4x1xf32> to vector<4x16xf32>
    %366 = vector.broadcast %66 : vector<1x16xf32> to vector<4x16xf32>
    %367 = arith.mulf %365, %366 : vector<4x16xf32>
    %368 = arith.addf %363, %367 : vector<4x16xf32>
    %369 = vector.extract_strided_slice %358 {offsets = [0, 2], sizes = [4, 1], strides = [1, 1]} : vector<4x4xf32> to vector<4x1xf32>
    %370 = vector.broadcast %369 : vector<4x1xf32> to vector<4x16xf32>
    %371 = vector.broadcast %67 : vector<1x16xf32> to vector<4x16xf32>
    %372 = arith.mulf %370, %371 : vector<4x16xf32>
    %373 = arith.addf %368, %372 : vector<4x16xf32>
    %374 = vector.extract_strided_slice %358 {offsets = [0, 3], sizes = [4, 1], strides = [1, 1]} : vector<4x4xf32> to vector<4x1xf32>
    %375 = vector.broadcast %374 : vector<4x1xf32> to vector<4x16xf32>
    %376 = vector.broadcast %68 : vector<1x16xf32> to vector<4x16xf32>
    %377 = arith.mulf %375, %376 : vector<4x16xf32>
    %378 = arith.addf %373, %377 : vector<4x16xf32>
    %379 = arith.addf %359, %378 : vector<4x16xf32>
    %380 = arith.negf %379 : vector<4x16xf32>
    %381 = math.exp %380 : vector<4x16xf32>
    %cst_30 = arith.constant 1.000000e+00 : f32
    %382 = vector.broadcast %cst_30 : f32 to vector<4x16xf32>
    %383 = arith.addf %382, %381 : vector<4x16xf32>
    %384 = arith.divf %382, %383 : vector<4x16xf32>
    %385 = math.tanh %379 : vector<4x16xf32>
    %386 = vector.extract_strided_slice %384 {offsets = [0, 0], sizes = [4, 4], strides = [1, 1]} : vector<4x16xf32> to vector<4x4xf32>
    %387 = vector.extract_strided_slice %384 {offsets = [0, 4], sizes = [4, 4], strides = [1, 1]} : vector<4x16xf32> to vector<4x4xf32>
    %388 = vector.extract_strided_slice %384 {offsets = [0, 12], sizes = [4, 4], strides = [1, 1]} : vector<4x16xf32> to vector<4x4xf32>
    %389 = vector.extract_strided_slice %385 {offsets = [0, 8], sizes = [4, 4], strides = [1, 1]} : vector<4x16xf32> to vector<4x4xf32>
    %390 = arith.mulf %387, %356 : vector<4x4xf32>
    %391 = arith.mulf %386, %389 : vector<4x4xf32>
    %392 = arith.addf %390, %391 : vector<4x4xf32>
    %393 = math.tanh %392 : vector<4x4xf32>
    %394 = arith.mulf %388, %393 : vector<4x4xf32>
    %395 = vector.extract_strided_slice %2 {offsets = [36, 72], sizes = [4, 16], strides = [1, 1]} : vector<48x104xf32> to vector<4x16xf32>
    %396 = vector.extract_strided_slice %394 {offsets = [0, 0], sizes = [4, 1], strides = [1, 1]} : vector<4x4xf32> to vector<4x1xf32>
    %397 = vector.broadcast %396 : vector<4x1xf32> to vector<4x16xf32>
    %398 = vector.broadcast %65 : vector<1x16xf32> to vector<4x16xf32>
    %399 = arith.mulf %397, %398 : vector<4x16xf32>
    %400 = vector.extract_strided_slice %394 {offsets = [0, 1], sizes = [4, 1], strides = [1, 1]} : vector<4x4xf32> to vector<4x1xf32>
    %401 = vector.broadcast %400 : vector<4x1xf32> to vector<4x16xf32>
    %402 = vector.broadcast %66 : vector<1x16xf32> to vector<4x16xf32>
    %403 = arith.mulf %401, %402 : vector<4x16xf32>
    %404 = arith.addf %399, %403 : vector<4x16xf32>
    %405 = vector.extract_strided_slice %394 {offsets = [0, 2], sizes = [4, 1], strides = [1, 1]} : vector<4x4xf32> to vector<4x1xf32>
    %406 = vector.broadcast %405 : vector<4x1xf32> to vector<4x16xf32>
    %407 = vector.broadcast %67 : vector<1x16xf32> to vector<4x16xf32>
    %408 = arith.mulf %406, %407 : vector<4x16xf32>
    %409 = arith.addf %404, %408 : vector<4x16xf32>
    %410 = vector.extract_strided_slice %394 {offsets = [0, 3], sizes = [4, 1], strides = [1, 1]} : vector<4x4xf32> to vector<4x1xf32>
    %411 = vector.broadcast %410 : vector<4x1xf32> to vector<4x16xf32>
    %412 = vector.broadcast %68 : vector<1x16xf32> to vector<4x16xf32>
    %413 = arith.mulf %411, %412 : vector<4x16xf32>
    %414 = arith.addf %409, %413 : vector<4x16xf32>
    %415 = arith.addf %395, %414 : vector<4x16xf32>
    %416 = arith.negf %415 : vector<4x16xf32>
    %417 = math.exp %416 : vector<4x16xf32>
    %cst_31 = arith.constant 1.000000e+00 : f32
    %418 = vector.broadcast %cst_31 : f32 to vector<4x16xf32>
    %419 = arith.addf %418, %417 : vector<4x16xf32>
    %420 = arith.divf %418, %419 : vector<4x16xf32>
    %421 = math.tanh %415 : vector<4x16xf32>
    %422 = vector.extract_strided_slice %420 {offsets = [0, 0], sizes = [4, 4], strides = [1, 1]} : vector<4x16xf32> to vector<4x4xf32>
    %423 = vector.extract_strided_slice %420 {offsets = [0, 4], sizes = [4, 4], strides = [1, 1]} : vector<4x16xf32> to vector<4x4xf32>
    %424 = vector.extract_strided_slice %420 {offsets = [0, 12], sizes = [4, 4], strides = [1, 1]} : vector<4x16xf32> to vector<4x4xf32>
    %425 = vector.extract_strided_slice %421 {offsets = [0, 8], sizes = [4, 4], strides = [1, 1]} : vector<4x16xf32> to vector<4x4xf32>
    %426 = arith.mulf %423, %392 : vector<4x4xf32>
    %427 = arith.mulf %422, %425 : vector<4x4xf32>
    %428 = arith.addf %426, %427 : vector<4x4xf32>
    %429 = math.tanh %428 : vector<4x4xf32>
    %430 = arith.mulf %424, %429 : vector<4x4xf32>
    %431 = vector.extract_strided_slice %2 {offsets = [40, 72], sizes = [4, 16], strides = [1, 1]} : vector<48x104xf32> to vector<4x16xf32>
    %432 = vector.extract_strided_slice %430 {offsets = [0, 0], sizes = [4, 1], strides = [1, 1]} : vector<4x4xf32> to vector<4x1xf32>
    %433 = vector.broadcast %432 : vector<4x1xf32> to vector<4x16xf32>
    %434 = vector.broadcast %65 : vector<1x16xf32> to vector<4x16xf32>
    %435 = arith.mulf %433, %434 : vector<4x16xf32>
    %436 = vector.extract_strided_slice %430 {offsets = [0, 1], sizes = [4, 1], strides = [1, 1]} : vector<4x4xf32> to vector<4x1xf32>
    %437 = vector.broadcast %436 : vector<4x1xf32> to vector<4x16xf32>
    %438 = vector.broadcast %66 : vector<1x16xf32> to vector<4x16xf32>
    %439 = arith.mulf %437, %438 : vector<4x16xf32>
    %440 = arith.addf %435, %439 : vector<4x16xf32>
    %441 = vector.extract_strided_slice %430 {offsets = [0, 2], sizes = [4, 1], strides = [1, 1]} : vector<4x4xf32> to vector<4x1xf32>
    %442 = vector.broadcast %441 : vector<4x1xf32> to vector<4x16xf32>
    %443 = vector.broadcast %67 : vector<1x16xf32> to vector<4x16xf32>
    %444 = arith.mulf %442, %443 : vector<4x16xf32>
    %445 = arith.addf %440, %444 : vector<4x16xf32>
    %446 = vector.extract_strided_slice %430 {offsets = [0, 3], sizes = [4, 1], strides = [1, 1]} : vector<4x4xf32> to vector<4x1xf32>
    %447 = vector.broadcast %446 : vector<4x1xf32> to vector<4x16xf32>
    %448 = vector.broadcast %68 : vector<1x16xf32> to vector<4x16xf32>
    %449 = arith.mulf %447, %448 : vector<4x16xf32>
    %450 = arith.addf %445, %449 : vector<4x16xf32>
    %451 = arith.addf %431, %450 : vector<4x16xf32>
    %452 = arith.negf %451 : vector<4x16xf32>
    %453 = math.exp %452 : vector<4x16xf32>
    %cst_32 = arith.constant 1.000000e+00 : f32
    %454 = vector.broadcast %cst_32 : f32 to vector<4x16xf32>
    %455 = arith.addf %454, %453 : vector<4x16xf32>
    %456 = arith.divf %454, %455 : vector<4x16xf32>
    %457 = math.tanh %451 : vector<4x16xf32>
    %458 = vector.extract_strided_slice %456 {offsets = [0, 0], sizes = [4, 4], strides = [1, 1]} : vector<4x16xf32> to vector<4x4xf32>
    %459 = vector.extract_strided_slice %456 {offsets = [0, 4], sizes = [4, 4], strides = [1, 1]} : vector<4x16xf32> to vector<4x4xf32>
    %460 = vector.extract_strided_slice %456 {offsets = [0, 12], sizes = [4, 4], strides = [1, 1]} : vector<4x16xf32> to vector<4x4xf32>
    %461 = vector.extract_strided_slice %457 {offsets = [0, 8], sizes = [4, 4], strides = [1, 1]} : vector<4x16xf32> to vector<4x4xf32>
    %462 = arith.mulf %459, %428 : vector<4x4xf32>
    %463 = arith.mulf %458, %461 : vector<4x4xf32>
    %464 = arith.addf %462, %463 : vector<4x4xf32>
    %465 = math.tanh %464 : vector<4x4xf32>
    %466 = arith.mulf %460, %465 : vector<4x4xf32>
    %467 = vector.extract_strided_slice %2 {offsets = [44, 72], sizes = [4, 16], strides = [1, 1]} : vector<48x104xf32> to vector<4x16xf32>
    %468 = vector.extract_strided_slice %466 {offsets = [0, 0], sizes = [4, 1], strides = [1, 1]} : vector<4x4xf32> to vector<4x1xf32>
    %469 = vector.broadcast %468 : vector<4x1xf32> to vector<4x16xf32>
    %470 = vector.broadcast %65 : vector<1x16xf32> to vector<4x16xf32>
    %471 = arith.mulf %469, %470 : vector<4x16xf32>
    %472 = vector.extract_strided_slice %466 {offsets = [0, 1], sizes = [4, 1], strides = [1, 1]} : vector<4x4xf32> to vector<4x1xf32>
    %473 = vector.broadcast %472 : vector<4x1xf32> to vector<4x16xf32>
    %474 = vector.broadcast %66 : vector<1x16xf32> to vector<4x16xf32>
    %475 = arith.mulf %473, %474 : vector<4x16xf32>
    %476 = arith.addf %471, %475 : vector<4x16xf32>
    %477 = vector.extract_strided_slice %466 {offsets = [0, 2], sizes = [4, 1], strides = [1, 1]} : vector<4x4xf32> to vector<4x1xf32>
    %478 = vector.broadcast %477 : vector<4x1xf32> to vector<4x16xf32>
    %479 = vector.broadcast %67 : vector<1x16xf32> to vector<4x16xf32>
    %480 = arith.mulf %478, %479 : vector<4x16xf32>
    %481 = arith.addf %476, %480 : vector<4x16xf32>
    %482 = vector.extract_strided_slice %466 {offsets = [0, 3], sizes = [4, 1], strides = [1, 1]} : vector<4x4xf32> to vector<4x1xf32>
    %483 = vector.broadcast %482 : vector<4x1xf32> to vector<4x16xf32>
    %484 = vector.broadcast %68 : vector<1x16xf32> to vector<4x16xf32>
    %485 = arith.mulf %483, %484 : vector<4x16xf32>
    %486 = arith.addf %481, %485 : vector<4x16xf32>
    %487 = arith.addf %467, %486 : vector<4x16xf32>
    %488 = arith.negf %487 : vector<4x16xf32>
    %489 = math.exp %488 : vector<4x16xf32>
    %cst_33 = arith.constant 1.000000e+00 : f32
    %490 = vector.broadcast %cst_33 : f32 to vector<4x16xf32>
    %491 = arith.addf %490, %489 : vector<4x16xf32>
    %492 = arith.divf %490, %491 : vector<4x16xf32>
    %493 = math.tanh %487 : vector<4x16xf32>
    %494 = vector.extract_strided_slice %492 {offsets = [0, 0], sizes = [4, 4], strides = [1, 1]} : vector<4x16xf32> to vector<4x4xf32>
    %495 = vector.extract_strided_slice %492 {offsets = [0, 4], sizes = [4, 4], strides = [1, 1]} : vector<4x16xf32> to vector<4x4xf32>
    %496 = vector.extract_strided_slice %492 {offsets = [0, 12], sizes = [4, 4], strides = [1, 1]} : vector<4x16xf32> to vector<4x4xf32>
    %497 = vector.extract_strided_slice %493 {offsets = [0, 8], sizes = [4, 4], strides = [1, 1]} : vector<4x16xf32> to vector<4x4xf32>
    %498 = arith.mulf %495, %464 : vector<4x4xf32>
    %499 = arith.mulf %494, %497 : vector<4x4xf32>
    %500 = arith.addf %498, %499 : vector<4x4xf32>
    %501 = math.tanh %500 : vector<4x4xf32>
    %502 = arith.mulf %496, %501 : vector<4x4xf32>
    %503 = vector.extract_strided_slice %2 {offsets = [44, 88], sizes = [4, 16], strides = [1, 1]} : vector<48x104xf32> to vector<4x16xf32>
    %cst_34 = arith.constant 0.000000e+00 : f32
    %504 = vector.broadcast %cst_34 : f32 to vector<4x4xf32>
    %505 = arith.negf %503 : vector<4x16xf32>
    %506 = math.exp %505 : vector<4x16xf32>
    %cst_35 = arith.constant 1.000000e+00 : f32
    %507 = vector.broadcast %cst_35 : f32 to vector<4x16xf32>
    %508 = arith.addf %507, %506 : vector<4x16xf32>
    %509 = arith.divf %507, %508 : vector<4x16xf32>
    %510 = math.tanh %503 : vector<4x16xf32>
    %511 = vector.extract_strided_slice %509 {offsets = [0, 0], sizes = [4, 4], strides = [1, 1]} : vector<4x16xf32> to vector<4x4xf32>
    %512 = vector.extract_strided_slice %509 {offsets = [0, 4], sizes = [4, 4], strides = [1, 1]} : vector<4x16xf32> to vector<4x4xf32>
    %513 = vector.extract_strided_slice %509 {offsets = [0, 12], sizes = [4, 4], strides = [1, 1]} : vector<4x16xf32> to vector<4x4xf32>
    %514 = vector.extract_strided_slice %510 {offsets = [0, 8], sizes = [4, 4], strides = [1, 1]} : vector<4x16xf32> to vector<4x4xf32>
    %515 = arith.mulf %512, %504 : vector<4x4xf32>
    %516 = arith.mulf %511, %514 : vector<4x4xf32>
    %517 = arith.addf %515, %516 : vector<4x4xf32>
    %518 = math.tanh %517 : vector<4x4xf32>
    %519 = arith.mulf %513, %518 : vector<4x4xf32>
    %520 = tpu.concatenate %502, %519 in 1 : vector<4x4xf32>, vector<4x4xf32> -> vector<4x8xf32>
    %cst_36 = arith.constant 0.000000e+00 : f32
    %521 = vector.broadcast %cst_36 : f32 to vector<4x8xf32>
    %522 = arith.maximumf %520, %521 : vector<4x8xf32>
    %523 = tpu.concatenate %63, %522 in 1 : vector<4x24xf32>, vector<4x8xf32> -> vector<4x32xf32>
    %c0_37 = arith.constant 0 : index
    %c0_38 = arith.constant 0 : index
    %524 = vector.load %arg3[%c0_37, %c0_38] : memref<4x9xbf16, #tpu.memory_space<vmem>>, vector<4x9xbf16>
    %c0_39 = arith.constant 0 : index
    %c0_40 = arith.constant 0 : index
    %525 = vector.load %arg4[%c0_39, %c0_40] : memref<9x32xbf16, #tpu.memory_space<vmem>>, vector<9x32xbf16>
    %cst_41 = arith.constant dense<0.000000e+00> : vector<4x32xf32>
    %526 = tpu.matmul %524, %525, %cst_41 {dimension_numbers = #tpu.dot_dimension_numbers<[1], [0], [0], [1], [0, 0, 1, 1], [], []>} : vector<4x9xbf16>, vector<9x32xbf16>, vector<4x32xf32> -> vector<4x32xf32>
    %c0_42 = arith.constant 0 : index
    %c0_43 = arith.constant 0 : index
    %527 = vector.load %arg5[%c0_42, %c0_43] : memref<4x64xf32, #tpu.memory_space<vmem>>, vector<4x32xf32>
    %c0_44 = arith.constant 0 : index
    %c32 = arith.constant 32 : index
    %528 = vector.load %arg5[%c0_44, %c32] : memref<4x64xf32, #tpu.memory_space<vmem>>, vector<4x32xf32>
    %529 = arith.mulf %527, %523 : vector<4x32xf32>
    %530 = arith.mulf %528, %526 : vector<4x32xf32>
    %531 = arith.addf %529, %530 : vector<4x32xf32>
    %532 = arith.truncf %531 : vector<4x32xf32> to vector<4x32xbf16>
    %c0_45 = arith.constant 0 : index
    %c0_46 = arith.constant 0 : index
    %533 = vector.load %arg6[%c0_45, %c0_46] : memref<33x3xbf16, #tpu.memory_space<vmem>>, vector<32x3xbf16>
    %cst_47 = arith.constant dense<0.000000e+00> : vector<4x3xf32>
    %534 = tpu.matmul %532, %533, %cst_47 {dimension_numbers = #tpu.dot_dimension_numbers<[1], [0], [0], [1], [0, 0, 1, 1], [], []>} : vector<4x32xbf16>, vector<32x3xbf16>, vector<4x3xf32> -> vector<4x3xf32>
    %c32_48 = arith.constant 32 : index
    %c0_49 = arith.constant 0 : index
    %535 = vector.load %arg6[%c32_48, %c0_49] : memref<33x3xbf16, #tpu.memory_space<vmem>>, vector<1x3xbf16>
    %536 = arith.extf %535 : vector<1x3xbf16> to vector<1x3xf32>
    %537 = vector.broadcast %536 : vector<1x3xf32> to vector<4x3xf32>
    %538 = arith.addf %534, %537 : vector<4x3xf32>
    %c0_50 = arith.constant 0 : index
    %c0_51 = arith.constant 0 : index
    %539 = vector.load %arg7[%c0_50, %c0_51] : memref<4x3xf32, #tpu.memory_space<vmem>>, vector<4x3xf32>
    tpu.vector_store %arg7[%c0_50, %c0_51], %538 {strides = array<i32>} : memref<4x3xf32, #tpu.memory_space<vmem>>, vector<4x3xf32>,
    return
  }
}

</mosaic_0001>

<bundles_post_ra>
// kernel: tpu_custom_call.1
= control target key start
LH: loop header
LB: loop body
LE: loop exit
PB: predicated region body
PF: predicated region fallthrough
CT: control target
= control target key end

     0   :  { %vm71_vm0 = vcmask 1040384   ;;  %v1566_v2 = vmov 0   ;;  %s1986_s0 = inlined_call_operand.vmem [shape: bf16[48,17], index: 0, kind: input, shape index: {}]   ;;  %s1987_s1 = inlined_call_operand.vmem [shape: bf16[17,104], index: 1, kind: input, shape index: {}]   ;;  %s1988_s2 = inlined_call_operand.vmem [shape: f32[4,16], index: 2, kind: input, shape index: {}]   ;;  %s1989_s3 = inlined_call_operand.vmem [shape: bf16[4,9], index: 3, kind: input, shape index: {}]   ;;  %s1990_s4 = inlined_call_operand.vmem [shape: bf16[9,32], index: 4, kind: input, shape index: {}]   ;;  %s1991_s5 = inlined_call_operand.vmem [shape: f32[4,64], index: 5, kind: input, shape index: {}]   ;;  %s1992_s6 = inlined_call_operand.vmem [shape: bf16[33,3], index: 6, kind: input, shape index: {}]   ;;  %s1993_s7 = inlined_call_operand.hbm [shape: f32[4,3], index: 7, kind: output, shape index: {}]  }
   0x1   :  { %v36_v0 = vld [vmem:[%s1987_s1 + $0x8] sm:$0x1]  ;;  %v73_v3 = vsel %vm71_vm0, 65535, %v1566_v2  ;;  %v360_v4 = vld [vmem:[%s1988_s2] sm:$0xf] }
   0x2   :  { %v57_v1 = vunpack.c.l.b16 %v36_v0  ;;  %v1630_v5 = vperm.slane %v360_v4, 0  ;;  %v1632_v6 = vperm.slane %v360_v4, 1  ;;  %v1634_v7 = vperm.slane %v360_v4, 2 }
   0x3   :  { %v1636_v8 = vperm.slane %v360_v4, 3 }
   0x4   :  { %12 = vsyncpa [#allocation3], 0  ;;  %v59_v9 = vpack.c.b16 %v57_v1, %v57_v1  ;;  %v362_v10 = vmul.f32 0.0, %v1630_v5  ;;  %v364_v11 = vmul.f32 0.0, %v1632_v6  ;;  %v367_v12 = vmul.f32 0.0, %v1634_v7  ;;  %v1386_v16 = vld [vmem:[%s1987_s1] sm:$0xff] }
   0x5   :  { %v370_v15 = vmul.f32 0.0, %v1636_v8  ;;  %v1383_v18 = vld [vmem:[%s1986_s0] sm:$0xff]  ;;  %v1384_v19 = vld [vmem:[%s1986_s0 + $0x8] sm:$0xff]  ;;  %vm61_vm1 = vcmask 138240   ;;  %s1567_s10 = smov 72   ;;  %s1568_s1 = smov 120  }
   0x6   :  { %v75_v13 = vand.u32 %v73_v3, %v59_v9  ;;  %v365_v14 = vadd.f32 %v364_v11, %v362_v10  ;;  %s1569_s11 = smov 4   ;;  %s1570_s12 = smov 8   ;;  %v1571_v44 = vmov 87   ;;  %v1572_v45 = vmov 86  }
   0x7   :  { %1412 = vset.pattern.permute.xlu1 %v1571_v44  ;;  %1411 = vset.pattern.permute.xlu0 %v1572_v45  ;;  %v1573_v46 = vmov 84   ;;  %v1574_v49 = vmov 85   ;;  %s1576_s15 = smov 104   ;;  %s1580_s24 = smov 96  }
   0x8   :  { %83 = vmatpush.bf16.msra.mxu0 %v75_v13  ;;  %1390 = vmatpush.bf16.msra.mxu3 %v75_v13  ;;  %v368_v17 = vadd.f32 %v367_v12, %v365_v14  ;;  %s1582_s30 = smov [#allocation2]  }
   0x9   :  { %1409 = vset.pattern.permute.xlu2 %v1573_v46  ;;  %s1326_s8 = sshll.u32 %s1582_s30, 4  ;;  %s1327_s8 = int_to_ptr.vmem [resolvable:$true] %s1326_s8 }
   0xa   :  { %v371_v20 = vadd.f32 %v370_v15, %v368_v17 }
   0xc   :  { %84 = vmatpush.bf16.msra.mxu0 %v1386_v16  ;;  %1391 = vmatpush.bf16.msra.mxu3 %v1386_v16 }
   0xd   :  { %373 = vrot.lane.b32.xlu0 %v371_v20, %s1567_s10 }
   0xf   :  { %1353 = vmatmul.msk.bf16.vlgmr.msra.gmra.mxu0 %vm61_vm1, %v1383_v18  ;;  %1354 = vmatmul.msk.bf16.vlgmr.msra.gmra.mxu3 %vm61_vm1, %v1384_v19 }
  0x7f   :  { %v374_v21 = vpop.permute.xlu0 %373 }
  0x8c   :  { %v1654_v22 = vpop.f32.mrf.mxu0 }
  0x8d   :  { %v376_v23 = vadd.f32 %v374_v21, %v1654_v22 }
  0x8f   :  { %1436 = vtanh.f32 %v376_v23  ;;  %v1356_v25 = vmul.f32 -1.442695, %v376_v23 }
  0x91   :  { %1438 = vpow2.f32 %v1356_v25 }
  0x95   :  { %v1437_v24 = vpop.eup %1436 }
  0x96   :  { %399 = vrot.lane.b32.xlu0 %v1437_v24, %s1568_s1 }
  0x97   :  { %v1439_v26 = vpop.eup %1438 }
  0x98   :  { %v380_v27 = vadd.f32 1.0, %v1439_v26 }
  0x9a   :  { %1440 = vrcp.f32 %v380_v27  ;;  %v392_v33 = vand.u32 2147483648, %v380_v27  ;;  %vm386_vm3 = vweird.f32 %v380_v27  ;;  %v390_v34 = vand.u32 2147483647, %v380_v27 }
  0x9c   :  { %v393_v36 = vor.u32 1.1754944e-38, %v392_v33  ;;  %vm391_vm5 = vcmp.eq.f32.partialorder %v390_v34, 8.507059e+37 }
  0xa0   :  { %v1441_v28 = vpop.eup %1440 }
  0xa1   :  { %v382_v29 = vmul.f32 %v1441_v28, %v380_v27  ;;  %vm387_vm2 = vweird.f32 %v1441_v28 }
  0xa2   :  { %vm388_vm4 = vmor %vm386_vm3, %vm387_vm2 }
  0xa3   :  { %v383_v30 = vsub.f32 1.0, %v382_v29 }
  0xa5   :  { %v384_v31 = vmul.f32 %v1441_v28, %v383_v30 }
  0xa7   :  { %v385_v32 = vadd.f32 %v1441_v28, %v384_v31 }
  0xa9   :  { %v389_v35 = vsel %vm388_vm4, %v1441_v28, %v385_v32 }
  0xaa   :  { %v394_v38 = vsel %vm391_vm5, %v393_v36, %v389_v35 }
  0xab   :  { %v397_v40 = vmul.f32 0.0, %v394_v38 }
 0x108   :  { %v400_v37 = vpop.permute.xlu0 %399 }
 0x109   :  { %v402_v39 = vmul.f32 %v400_v37, %v394_v38 }
 0x10b   :  { %404 = vrot.lane.b32.xlu1 %v402_v39, %s1569_s11 }
 0x17d   :  { %v405_v41 = vpop.permute.xlu1 %404 }
 0x17e   :  { %v407_v42 = vadd.f32 %v405_v41, %v397_v40  ;;  %v1683_v40 = vpop.f32.mrf.mxu0 }
 0x180   :  { %1442 = vtanh.f32 %v407_v42  ;;  %v465_v20 = vrot.slane %v407_v42, 4 }
 0x186   :  { %v1443_v43 = vpop.eup %1442 }
 0x187   :  { %410 = vrot.lane.b32.xlu1 %v1443_v43, %s1570_s12 }
 0x1f9   :  { %v411_v47 = vpop.permute.xlu1 %410 }
 0x1fa   :  { %v413_v48 = vmul.f32 %v411_v47, %v394_v38 }
 0x1fc   :  { %433 = vperm.xlu1 %1412, %v413_v48   ;;  %427 = vperm.xlu0 %1411, %v413_v48  }
 0x1fd   :  { %416 = vperm.xlu2 %1409, %v413_v48  }
 0x204   :  { %1413 = vset.pattern.permute.xlu1 %v1573_v46 }
 0x205   :  { %1410 = vset.pattern.permute.xlu2 %v1574_v49 }
 0x206   :  { %421 = vperm.xlu2 %1410, %v413_v48  }
 0x257   :  { %v417_v50 = vpop.permute.xlu2 %416 }
 0x258   :  { %v419_v53 = vmul.f32 %v417_v50, %v1630_v5 }
 0x260   :  { %v422_v51 = vpop.permute.xlu2 %421 }
 0x261   :  { %v424_v52 = vmul.f32 %v422_v51, %v1632_v6 }
 0x263   :  { %v425_v56 = vadd.f32 %v424_v52, %v419_v53 }
 0x26e   :  { %v434_v54 = vpop.permute.xlu1 %433  ;;  %v428_v55 = vpop.permute.xlu0 %427 }
 0x26f   :  { %v430_v57 = vmul.f32 %v428_v55, %v1634_v7  ;;  %v436_v58 = vmul.f32 %v434_v54, %v1636_v8 }
 0x271   :  { %v431_v59 = vadd.f32 %v430_v57, %v425_v56 }
 0x273   :  { %v437_v60 = vadd.f32 %v436_v58, %v431_v59 }
 0x275   :  { %v439_v61 = vrot.slane %v437_v60, 4 }
 0x277   :  { %440 = vrot.lane.b32.xlu2 %v439_v61, %s1567_s10 }
 0x2d1   :  { %v441_v62 = vpop.permute.xlu2 %440 }
 0x2d2   :  { %v443_v63 = vadd.f32 %v441_v62, %v1654_v22 }
 0x2d4   :  { %1444 = vtanh.f32 %v443_v63  ;;  %v1357_v1 = vmul.f32 -1.442695, %v443_v63 }
 0x2d6   :  { %1446 = vpow2.f32 %v1357_v1 }
 0x2da   :  { %v1445_v0 = vpop.eup %1444 }
 0x2db   :  { %469 = vrot.lane.b32.xlu1 %v1445_v0, %s1568_s1 }
 0x2dc   :  { %v1447_v2 = vpop.eup %1446 }
 0x2dd   :  { %v447_v3 = vadd.f32 1.0, %v1447_v2 }
 0x2df   :  { %1448 = vrcp.f32 %v447_v3  ;;  %v459_v13 = vand.u32 2147483648, %v447_v3  ;;  %vm453_vm7 = vweird.f32 %v447_v3  ;;  %v457_v14 = vand.u32 2147483647, %v447_v3 }
 0x2e1   :  { %v460_v16 = vor.u32 1.1754944e-38, %v459_v13  ;;  %vm458_vm9 = vcmp.eq.f32.partialorder %v457_v14, 8.507059e+37 }
 0x2e5   :  { %v1449_v4 = vpop.eup %1448 }
 0x2e6   :  { %v449_v9 = vmul.f32 %v1449_v4, %v447_v3  ;;  %vm454_vm6 = vweird.f32 %v1449_v4 }
 0x2e7   :  { %vm455_vm8 = vmor %vm453_vm7, %vm454_vm6 }
 0x2e8   :  { %v450_v10 = vsub.f32 1.0, %v449_v9 }
 0x2ea   :  { %v451_v11 = vmul.f32 %v1449_v4, %v450_v10 }
 0x2ec   :  { %v452_v12 = vadd.f32 %v1449_v4, %v451_v11 }
 0x2ee   :  { %v456_v15 = vsel %vm455_vm8, %v1449_v4, %v452_v12 }
 0x2ef   :  { %v461_v18 = vsel %vm458_vm9, %v460_v16, %v456_v15 }
 0x2f0   :  { %v467_v21 = vmul.f32 %v465_v20, %v461_v18 }
 0x34d   :  { %v470_v17 = vpop.permute.xlu1 %469 }
 0x34e   :  { %v472_v19 = vmul.f32 %v470_v17, %v461_v18 }
 0x350   :  { %474 = vrot.lane.b32.xlu2 %v472_v19, %s1569_s11 }
 0x3aa   :  { %v475_v23 = vpop.permute.xlu2 %474 }
 0x3ab   :  { %v477_v24 = vadd.f32 %v475_v23, %v467_v21 }
 0x3ad   :  { %1450 = vtanh.f32 %v477_v24  ;;  %v535_v62 = vrot.slane %v477_v24, 4 }
 0x3b3   :  { %v1451_v25 = vpop.eup %1450 }
 0x3b4   :  { %480 = vrot.lane.b32.xlu0 %v1451_v25, %s1570_s12 }
 0x426   :  { %v481_v26 = vpop.permute.xlu0 %480 }
 0x427   :  { %v483_v27 = vmul.f32 %v481_v26, %v461_v18 }
 0x429   :  { %497 = vperm.xlu0 %1411, %v483_v27   ;;  %491 = vperm.xlu2 %1410, %v483_v27  }
 0x42a   :  { %486 = vperm.xlu1 %1413, %v483_v27  }
 0x431   :  { %1415 = vset.pattern.permute.xlu0 %v1573_v46  ;;  %1417 = vset.pattern.permute.xlu2 %v1572_v45 }
 0x432   :  { %1414 = vset.pattern.permute.xlu1 %v1571_v44 }
 0x433   :  { %503 = vperm.xlu1 %1414, %v483_v27  }
 0x43b   :  { %1416 = vset.pattern.permute.xlu1 %v1574_v49 }
 0x483   :  { %v492_v29 = vpop.permute.xlu2 %491 }
 0x484   :  { %v494_v31 = vmul.f32 %v492_v29, %v1632_v6 }
 0x49b   :  { %v498_v32 = vpop.permute.xlu0 %497 }
 0x49c   :  { %v487_v28 = vpop.permute.xlu1 %486  ;;  %v500_v34 = vmul.f32 %v498_v32, %v1634_v7 }
 0x49d   :  { %v489_v30 = vmul.f32 %v487_v28, %v1630_v5 }
 0x49f   :  { %v495_v33 = vadd.f32 %v494_v31, %v489_v30 }
 0x4a1   :  { %v501_v36 = vadd.f32 %v500_v34, %v495_v33 }
 0x4a5   :  { %v504_v35 = vpop.permute.xlu1 %503 }
 0x4a6   :  { %v506_v37 = vmul.f32 %v504_v35, %v1636_v8 }
 0x4a8   :  { %v507_v38 = vadd.f32 %v506_v37, %v501_v36 }
 0x4aa   :  { %v509_v39 = vrot.slane %v507_v38, 4 }
 0x4ac   :  { %510 = vrot.lane.b32.xlu2 %v509_v39, %s1567_s10 }
 0x506   :  { %v511_v41 = vpop.permute.xlu2 %510 }
 0x507   :  { %v513_v42 = vadd.f32 %v511_v41, %v1683_v40 }
 0x509   :  { %1452 = vtanh.f32 %v513_v42  ;;  %v1358_v45 = vmul.f32 -1.442695, %v513_v42 }
 0x50b   :  { %1454 = vpow2.f32 %v1358_v45 }
 0x50f   :  { %v1453_v43 = vpop.eup %1452 }
 0x510   :  { %539 = vrot.lane.b32.xlu0 %v1453_v43, %s1568_s1 }
 0x511   :  { %v1455_v47 = vpop.eup %1454 }
 0x512   :  { %v517_v48 = vadd.f32 1.0, %v1455_v47 }
 0x514   :  { %1456 = vrcp.f32 %v517_v48  ;;  %v529_v55 = vand.u32 2147483648, %v517_v48  ;;  %vm523_vm11 = vweird.f32 %v517_v48  ;;  %v527_v56 = vand.u32 2147483647, %v517_v48 }
 0x516   :  { %v530_v58 = vor.u32 1.1754944e-38, %v529_v55  ;;  %vm528_vm13 = vcmp.eq.f32.partialorder %v527_v56, 8.507059e+37 }
 0x51a   :  { %v1457_v50 = vpop.eup %1456 }
 0x51b   :  { %v519_v51 = vmul.f32 %v1457_v50, %v517_v48  ;;  %vm524_vm10 = vweird.f32 %v1457_v50 }
 0x51c   :  { %vm525_vm12 = vmor %vm523_vm11, %vm524_vm10 }
 0x51d   :  { %v520_v52 = vsub.f32 1.0, %v519_v51  ;;  %v1385_v51 = vld [vmem:[%s1986_s0 + $0x10] sm:$0xff]  ;;  %s1575_s0 = smov 112  }
 0x51e   :  { %1355 = vmatmul.msk.bf16.gmra.mxu3 %vm61_vm1, %v1385_v51 }
 0x51f   :  { %v521_v53 = vmul.f32 %v1457_v50, %v520_v52 }
 0x521   :  { %v522_v54 = vadd.f32 %v1457_v50, %v521_v53 }
 0x523   :  { %v526_v57 = vsel %vm525_vm12, %v1457_v50, %v522_v54 }
 0x524   :  { %v531_v60 = vsel %vm528_vm13, %v530_v58, %v526_v57 }
 0x525   :  { %v537_v63 = vmul.f32 %v535_v62, %v531_v60 }
 0x582   :  { %v540_v59 = vpop.permute.xlu0 %539 }
 0x583   :  { %v542_v61 = vmul.f32 %v540_v59, %v531_v60 }
 0x585   :  { %544 = vrot.lane.b32.xlu1 %v542_v61, %s1569_s11 }
 0x5f7   :  { %v545_v0 = vpop.permute.xlu1 %544 }
 0x5f8   :  { %v547_v1 = vadd.f32 %v545_v0, %v537_v63  ;;  %v1711_v0 = vpop.f32.mrf.mxu3 }
 0x5fa   :  { %1458 = vtanh.f32 %v547_v1  ;;  %v605_v41 = vrot.slane %v547_v1, 4 }
 0x600   :  { %v1459_v2 = vpop.eup %1458 }
 0x601   :  { %550 = vrot.lane.b32.xlu2 %v1459_v2, %s1570_s12 }
 0x65b   :  { %v551_v3 = vpop.permute.xlu2 %550 }
 0x65c   :  { %v553_v4 = vmul.f32 %v551_v3, %v531_v60 }
 0x65e   :  { %567 = vperm.xlu2 %1417, %v553_v4   ;;  %561 = vperm.xlu1 %1416, %v553_v4  }
 0x65f   :  { %556 = vperm.xlu0 %1415, %v553_v4  }
 0x666   :  { %1418 = vset.pattern.permute.xlu1 %v1571_v44 }
 0x667   :  { %573 = vperm.xlu1 %1418, %v553_v4  }
 0x66f   :  { %1419 = vset.pattern.permute.xlu1 %v1574_v49 }
 0x6b8   :  { %v568_v13 = vpop.permute.xlu2 %567 }
 0x6b9   :  { %v570_v15 = vmul.f32 %v568_v13, %v1634_v7 }
 0x6d0   :  { %v562_v9 = vpop.permute.xlu1 %561 }
 0x6d1   :  { %v557_v10 = vpop.permute.xlu0 %556  ;;  %v564_v11 = vmul.f32 %v562_v9, %v1632_v6 }
 0x6d2   :  { %v559_v12 = vmul.f32 %v557_v10, %v1630_v5 }
 0x6d4   :  { %v565_v14 = vadd.f32 %v564_v11, %v559_v12 }
 0x6d6   :  { %v571_v17 = vadd.f32 %v570_v15, %v565_v14 }
 0x6d9   :  { %v574_v16 = vpop.permute.xlu1 %573 }
 0x6da   :  { %v576_v18 = vmul.f32 %v574_v16, %v1636_v8 }
 0x6dc   :  { %v577_v19 = vadd.f32 %v576_v18, %v571_v17 }
 0x6de   :  { %v579_v20 = vrot.slane %v577_v19, 4 }
 0x6e0   :  { %580 = vrot.lane.b32.xlu2 %v579_v20, %s1567_s10 }
 0x73a   :  { %v581_v21 = vpop.permute.xlu2 %580 }
 0x73b   :  { %v583_v23 = vadd.f32 %v581_v21, %v1683_v40 }
 0x73d   :  { %1460 = vtanh.f32 %v583_v23  ;;  %v1359_v25 = vmul.f32 -1.442695, %v583_v23 }
 0x73f   :  { %1462 = vpow2.f32 %v1359_v25 }
 0x743   :  { %v1461_v24 = vpop.eup %1460 }
 0x744   :  { %609 = vrot.lane.b32.xlu0 %v1461_v24, %s1568_s1 }
 0x745   :  { %v1463_v26 = vpop.eup %1462 }
 0x746   :  { %v587_v27 = vadd.f32 1.0, %v1463_v26 }
 0x748   :  { %1464 = vrcp.f32 %v587_v27  ;;  %v599_v33 = vand.u32 2147483648, %v587_v27  ;;  %vm593_vm15 = vweird.f32 %v587_v27  ;;  %v597_v34 = vand.u32 2147483647, %v587_v27 }
 0x74a   :  { %v600_v36 = vor.u32 1.1754944e-38, %v599_v33  ;;  %vm598_vm3 = vcmp.eq.f32.partialorder %v597_v34, 8.507059e+37 }
 0x74e   :  { %v1465_v28 = vpop.eup %1464 }
 0x74f   :  { %v589_v29 = vmul.f32 %v1465_v28, %v587_v27  ;;  %vm594_vm14 = vweird.f32 %v1465_v28 }
 0x750   :  { %vm595_vm2 = vmor %vm593_vm15, %vm594_vm14 }
 0x751   :  { %v590_v30 = vsub.f32 1.0, %v589_v29 }
 0x753   :  { %v591_v31 = vmul.f32 %v1465_v28, %v590_v30 }
 0x755   :  { %v592_v32 = vadd.f32 %v1465_v28, %v591_v31 }
 0x757   :  { %v596_v35 = vsel %vm595_vm2, %v1465_v28, %v592_v32 }
 0x758   :  { %v601_v38 = vsel %vm598_vm3, %v600_v36, %v596_v35 }
 0x759   :  { %v607_v42 = vmul.f32 %v605_v41, %v601_v38 }
 0x7b6   :  { %v610_v37 = vpop.permute.xlu0 %609 }
 0x7b7   :  { %v612_v39 = vmul.f32 %v610_v37, %v601_v38 }
 0x7b9   :  { %614 = vrot.lane.b32.xlu1 %v612_v39, %s1569_s11 }
 0x82b   :  { %v615_v43 = vpop.permute.xlu1 %614 }
 0x82c   :  { %v617_v45 = vadd.f32 %v615_v43, %v607_v42 }
 0x82e   :  { %1466 = vtanh.f32 %v617_v45  ;;  %v675_v24 = vrot.slane %v617_v45, 4 }
 0x834   :  { %v1467_v47 = vpop.eup %1466 }
 0x835   :  { %620 = vrot.lane.b32.xlu2 %v1467_v47, %s1570_s12 }
 0x88f   :  { %v621_v48 = vpop.permute.xlu2 %620 }
 0x890   :  { %v623_v50 = vmul.f32 %v621_v48, %v601_v38 }
 0x892   :  { %637 = vperm.xlu2 %1417, %v623_v50   ;;  %631 = vperm.xlu1 %1419, %v623_v50  }
 0x893   :  { %626 = vperm.xlu0 %1415, %v623_v50  }
 0x89b   :  { %1420 = vset.pattern.permute.xlu0 %v1571_v44 }
 0x89c   :  { %643 = vperm.xlu0 %1420, %v623_v50  }
 0x8a4   :  { %1421 = vset.pattern.permute.xlu0 %v1573_v46 }
 0x8ec   :  { %v638_v56 = vpop.permute.xlu2 %637 }
 0x8ed   :  { %v640_v58 = vmul.f32 %v638_v56, %v1634_v7 }
 0x904   :  { %v632_v52 = vpop.permute.xlu1 %631 }
 0x905   :  { %v627_v53 = vpop.permute.xlu0 %626  ;;  %v634_v54 = vmul.f32 %v632_v52, %v1632_v6 }
 0x906   :  { %v629_v55 = vmul.f32 %v627_v53, %v1630_v5 }
 0x908   :  { %v635_v57 = vadd.f32 %v634_v54, %v629_v55 }
 0x90a   :  { %v641_v60 = vadd.f32 %v640_v58, %v635_v57 }
 0x90e   :  { %v644_v59 = vpop.permute.xlu0 %643 }
 0x90f   :  { %v646_v61 = vmul.f32 %v644_v59, %v1636_v8 }
 0x911   :  { %v647_v62 = vadd.f32 %v646_v61, %v641_v60 }
 0x913   :  { %v649_v63 = vrot.slane %v647_v62, 4 }
 0x915   :  { %650 = vrot.lane.b32.xlu1 %v649_v63, %s1567_s10 }
 0x987   :  { %v651_v1 = vpop.permute.xlu1 %650 }
 0x988   :  { %v653_v2 = vadd.f32 %v651_v1, %v1711_v0 }
 0x98a   :  { %1468 = vtanh.f32 %v653_v2  ;;  %v1360_v4 = vmul.f32 -1.442695, %v653_v2 }
 0x98c   :  { %1470 = vpow2.f32 %v1360_v4 }
 0x990   :  { %v1469_v3 = vpop.eup %1468 }
 0x991   :  { %679 = vrot.lane.b32.xlu2 %v1469_v3, %s1568_s1 }
 0x992   :  { %v1471_v9 = vpop.eup %1470 }
 0x993   :  { %v657_v10 = vadd.f32 1.0, %v1471_v9 }
 0x995   :  { %1472 = vrcp.f32 %v657_v10  ;;  %v669_v16 = vand.u32 2147483648, %v657_v10  ;;  %vm663_vm4 = vweird.f32 %v657_v10  ;;  %v667_v17 = vand.u32 2147483647, %v657_v10 }
 0x997   :  { %v670_v19 = vor.u32 1.1754944e-38, %v669_v16  ;;  %vm668_vm6 = vcmp.eq.f32.partialorder %v667_v17, 8.507059e+37 }
 0x99b   :  { %v1473_v11 = vpop.eup %1472 }
 0x99c   :  { %v659_v12 = vmul.f32 %v1473_v11, %v657_v10  ;;  %vm664_vm1 = vweird.f32 %v1473_v11 }
 0x99d   :  { %vm665_vm5 = vmor %vm663_vm4, %vm664_vm1 }
 0x99e   :  { %v660_v13 = vsub.f32 1.0, %v659_v12 }
 0x9a0   :  { %v661_v14 = vmul.f32 %v1473_v11, %v660_v13 }
 0x9a2   :  { %v662_v15 = vadd.f32 %v1473_v11, %v661_v14 }
 0x9a4   :  { %v666_v18 = vsel %vm665_vm5, %v1473_v11, %v662_v15 }
 0x9a5   :  { %v671_v21 = vsel %vm668_vm6, %v670_v19, %v666_v18 }
 0x9a6   :  { %v677_v25 = vmul.f32 %v675_v24, %v671_v21 }
 0x9eb   :  { %v680_v20 = vpop.permute.xlu2 %679 }
 0x9ec   :  { %v682_v23 = vmul.f32 %v680_v20, %v671_v21 }
 0x9ee   :  { %684 = vrot.lane.b32.xlu1 %v682_v23, %s1569_s11 }
 0xa60   :  { %v685_v26 = vpop.permute.xlu1 %684 }
 0xa61   :  { %v687_v27 = vadd.f32 %v685_v26, %v677_v25  ;;  %v1735_v26 = vpop.f32.mrf.mxu3 }
 0xa63   :  { %1474 = vtanh.f32 %v687_v27  ;;  %v745_v2 = vrot.slane %v687_v27, 4 }
 0xa69   :  { %v1475_v28 = vpop.eup %1474 }
 0xa6a   :  { %690 = vrot.lane.b32.xlu2 %v1475_v28, %s1570_s12 }
 0xac4   :  { %v691_v29 = vpop.permute.xlu2 %690 }
 0xac5   :  { %v693_v30 = vmul.f32 %v691_v29, %v671_v21 }
 0xac7   :  { %707 = vperm.xlu2 %1417, %v693_v30   ;;  %701 = vperm.xlu1 %1419, %v693_v30  }
 0xac8   :  { %696 = vperm.xlu0 %1421, %v693_v30  }
 0xacf   :  { %1422 = vset.pattern.permute.xlu1 %v1571_v44 }
 0xad0   :  { %713 = vperm.xlu1 %1422, %v693_v30  }
 0xad8   :  { %1423 = vset.pattern.permute.xlu1 %v1574_v49 }
 0xb21   :  { %v708_v35 = vpop.permute.xlu2 %707 }
 0xb22   :  { %v710_v37 = vmul.f32 %v708_v35, %v1634_v7 }
 0xb39   :  { %v702_v31 = vpop.permute.xlu1 %701 }
 0xb3a   :  { %v697_v32 = vpop.permute.xlu0 %696  ;;  %v704_v33 = vmul.f32 %v702_v31, %v1632_v6 }
 0xb3b   :  { %v699_v34 = vmul.f32 %v697_v32, %v1630_v5 }
 0xb3d   :  { %v705_v36 = vadd.f32 %v704_v33, %v699_v34 }
 0xb3f   :  { %v711_v39 = vadd.f32 %v710_v37, %v705_v36 }
 0xb42   :  { %v714_v38 = vpop.permute.xlu1 %713 }
 0xb43   :  { %v716_v41 = vmul.f32 %v714_v38, %v1636_v8 }
 0xb45   :  { %v717_v42 = vadd.f32 %v716_v41, %v711_v39 }
 0xb47   :  { %v719_v43 = vrot.slane %v717_v42, 4 }
 0xb49   :  { %720 = vrot.lane.b32.xlu2 %v719_v43, %s1567_s10 }
 0xba3   :  { %v721_v45 = vpop.permute.xlu2 %720 }
 0xba4   :  { %v723_v47 = vadd.f32 %v721_v45, %v1711_v0 }
 0xba6   :  { %1476 = vtanh.f32 %v723_v47  ;;  %v1361_v50 = vmul.f32 -1.442695, %v723_v47 }
 0xba8   :  { %1478 = vpow2.f32 %v1361_v50 }
 0xbac   :  { %v1477_v48 = vpop.eup %1476 }
 0xbad   :  { %749 = vrot.lane.b32.xlu0 %v1477_v48, %s1568_s1 }
 0xbae   :  { %v1479_v51 = vpop.eup %1478 }
 0xbaf   :  { %v727_v52 = vadd.f32 1.0, %v1479_v51 }
 0xbb1   :  { %1480 = vrcp.f32 %v727_v52  ;;  %v739_v58 = vand.u32 2147483648, %v727_v52  ;;  %vm733_vm8 = vweird.f32 %v727_v52  ;;  %v737_v59 = vand.u32 2147483647, %v727_v52 }
 0xbb3   :  { %v740_v61 = vor.u32 1.1754944e-38, %v739_v58  ;;  %vm738_vm10 = vcmp.eq.f32.partialorder %v737_v59, 8.507059e+37 }
 0xbb7   :  { %v1481_v53 = vpop.eup %1480 }
 0xbb8   :  { %v729_v54 = vmul.f32 %v1481_v53, %v727_v52  ;;  %vm734_vm7 = vweird.f32 %v1481_v53 }
 0xbb9   :  { %vm735_vm9 = vmor %vm733_vm8, %vm734_vm7 }
 0xbba   :  { %v730_v55 = vsub.f32 1.0, %v729_v54 }
 0xbbc   :  { %v731_v56 = vmul.f32 %v1481_v53, %v730_v55 }
 0xbbe   :  { %v732_v57 = vadd.f32 %v1481_v53, %v731_v56 }
 0xbc0   :  { %v736_v60 = vsel %vm735_vm9, %v1481_v53, %v732_v57 }
 0xbc1   :  { %v741_v63 = vsel %vm738_vm10, %v740_v61, %v736_v60 }
 0xbc2   :  { %v747_v3 = vmul.f32 %v745_v2, %v741_v63 }
 0xc1f   :  { %v750_v62 = vpop.permute.xlu0 %749 }
 0xc20   :  { %v752_v1 = vmul.f32 %v750_v62, %v741_v63 }
 0xc22   :  { %754 = vrot.lane.b32.xlu1 %v752_v1, %s1569_s11 }
 0xc94   :  { %v755_v4 = vpop.permute.xlu1 %754 }
 0xc95   :  { %v757_v9 = vadd.f32 %v755_v4, %v747_v3 }
 0xc97   :  { %1482 = vtanh.f32 %v757_v9  ;;  %v815_v48 = vrot.slane %v757_v9, 4 }
 0xc9d   :  { %v1483_v10 = vpop.eup %1482 }
 0xc9e   :  { %760 = vrot.lane.b32.xlu2 %v1483_v10, %s1570_s12 }
 0xcf8   :  { %v761_v11 = vpop.permute.xlu2 %760 }
 0xcf9   :  { %v763_v12 = vmul.f32 %v761_v11, %v741_v63 }
 0xcfb   :  { %777 = vperm.xlu2 %1417, %v763_v12   ;;  %771 = vperm.xlu1 %1423, %v763_v12  }
 0xcfc   :  { %766 = vperm.xlu0 %1421, %v763_v12  }
 0xd04   :  { %1424 = vset.pattern.permute.xlu0 %v1571_v44 }
 0xd05   :  { %783 = vperm.xlu0 %1424, %v763_v12  }
 0xd0d   :  { %1425 = vset.pattern.permute.xlu0 %v1573_v46 }
 0xd55   :  { %v778_v17 = vpop.permute.xlu2 %777 }
 0xd56   :  { %v780_v19 = vmul.f32 %v778_v17, %v1634_v7 }
 0xd6d   :  { %v772_v13 = vpop.permute.xlu1 %771 }
 0xd6e   :  { %v767_v14 = vpop.permute.xlu0 %766  ;;  %v774_v15 = vmul.f32 %v772_v13, %v1632_v6 }
 0xd6f   :  { %v769_v16 = vmul.f32 %v767_v14, %v1630_v5 }
 0xd71   :  { %v775_v18 = vadd.f32 %v774_v15, %v769_v16 }
 0xd73   :  { %v781_v21 = vadd.f32 %v780_v19, %v775_v18 }
 0xd77   :  { %v784_v20 = vpop.permute.xlu0 %783 }
 0xd78   :  { %v786_v23 = vmul.f32 %v784_v20, %v1636_v8 }
 0xd7a   :  { %v787_v24 = vadd.f32 %v786_v23, %v781_v21 }
 0xd7c   :  { %v789_v25 = vrot.slane %v787_v24, 4 }
 0xd7e   :  { %790 = vrot.lane.b32.xlu1 %v789_v25, %s1567_s10 }
 0xdf0   :  { %v791_v27 = vpop.permute.xlu1 %790 }
 0xdf1   :  { %v793_v28 = vadd.f32 %v791_v27, %v1735_v26 }
 0xdf3   :  { %1484 = vtanh.f32 %v793_v28  ;;  %v1362_v30 = vmul.f32 -1.442695, %v793_v28 }
 0xdf5   :  { %1486 = vpow2.f32 %v1362_v30 }
 0xdf9   :  { %v1485_v29 = vpop.eup %1484 }
 0xdfa   :  { %819 = vrot.lane.b32.xlu2 %v1485_v29, %s1568_s1 }
 0xdfb   :  { %v1487_v31 = vpop.eup %1486 }
 0xdfc   :  { %v797_v32 = vadd.f32 1.0, %v1487_v31 }
 0xdfe   :  { %1488 = vrcp.f32 %v797_v32  ;;  %v809_v38 = vand.u32 2147483648, %v797_v32  ;;  %vm803_vm12 = vweird.f32 %v797_v32  ;;  %v807_v39 = vand.u32 2147483647, %v797_v32 }
 0xe00   :  { %v810_v42 = vor.u32 1.1754944e-38, %v809_v38  ;;  %vm808_vm14 = vcmp.eq.f32.partialorder %v807_v39, 8.507059e+37 }
 0xe04   :  { %v1489_v33 = vpop.eup %1488 }
 0xe05   :  { %v799_v34 = vmul.f32 %v1489_v33, %v797_v32  ;;  %vm804_vm11 = vweird.f32 %v1489_v33 }
 0xe06   :  { %vm805_vm13 = vmor %vm803_vm12, %vm804_vm11 }
 0xe07   :  { %v800_v35 = vsub.f32 1.0, %v799_v34 }
 0xe09   :  { %v801_v36 = vmul.f32 %v1489_v33, %v800_v35 }
 0xe0b   :  { %v802_v37 = vadd.f32 %v1489_v33, %v801_v36 }
 0xe0d   :  { %v806_v41 = vsel %vm805_vm13, %v1489_v33, %v802_v37 }
 0xe0e   :  { %v811_v45 = vsel %vm808_vm14, %v810_v42, %v806_v41 }
 0xe0f   :  { %v817_v50 = vmul.f32 %v815_v48, %v811_v45 }
 0xe54   :  { %v820_v43 = vpop.permute.xlu2 %819 }
 0xe55   :  { %v822_v47 = vmul.f32 %v820_v43, %v811_v45 }
 0xe57   :  { %824 = vrot.lane.b32.xlu1 %v822_v47, %s1569_s11 }
 0xec9   :  { %v825_v51 = vpop.permute.xlu1 %824 }
 0xeca   :  { %v827_v52 = vadd.f32 %v825_v51, %v817_v50 }
 0xecc   :  { %1490 = vtanh.f32 %v827_v52  ;;  %v885_v29 = vrot.slane %v827_v52, 4  ;;  %v1759_v52 = vpop.f32.mrf.mxu3 }
 0xed2   :  { %v1491_v53 = vpop.eup %1490 }
 0xed3   :  { %830 = vrot.lane.b32.xlu2 %v1491_v53, %s1570_s12 }
 0xf2d   :  { %v831_v54 = vpop.permute.xlu2 %830 }
 0xf2e   :  { %v833_v55 = vmul.f32 %v831_v54, %v811_v45 }
 0xf30   :  { %847 = vperm.xlu2 %1417, %v833_v55   ;;  %841 = vperm.xlu1 %1423, %v833_v55  }
 0xf31   :  { %836 = vperm.xlu0 %1425, %v833_v55  }
 0xf38   :  { %1426 = vset.pattern.permute.xlu1 %v1571_v44 }
 0xf39   :  { %853 = vperm.xlu1 %1426, %v833_v55  }
 0xf41   :  { %1427 = vset.pattern.permute.xlu1 %v1574_v49 }
 0xf8a   :  { %v848_v60 = vpop.permute.xlu2 %847 }
 0xf8b   :  { %v850_v62 = vmul.f32 %v848_v60, %v1634_v7 }
 0xfa2   :  { %v842_v56 = vpop.permute.xlu1 %841 }
 0xfa3   :  { %v837_v57 = vpop.permute.xlu0 %836  ;;  %v844_v58 = vmul.f32 %v842_v56, %v1632_v6 }
 0xfa4   :  { %v839_v59 = vmul.f32 %v837_v57, %v1630_v5 }
 0xfa6   :  { %v845_v61 = vadd.f32 %v844_v58, %v839_v59 }
 0xfa8   :  { %v851_v1 = vadd.f32 %v850_v62, %v845_v61 }
 0xfab   :  { %v854_v63 = vpop.permute.xlu1 %853 }
 0xfac   :  { %v856_v2 = vmul.f32 %v854_v63, %v1636_v8 }
 0xfae   :  { %v857_v3 = vadd.f32 %v856_v2, %v851_v1 }
 0xfb0   :  { %v859_v4 = vrot.slane %v857_v3, 4 }
 0xfb2   :  { %860 = vrot.lane.b32.xlu2 %v859_v4, %s1567_s10 }
0x100c   :  { %v861_v9 = vpop.permute.xlu2 %860 }
0x100d   :  { %v863_v10 = vadd.f32 %v861_v9, %v1735_v26 }
0x100f   :  { %1492 = vtanh.f32 %v863_v10  ;;  %v1363_v12 = vmul.f32 -1.442695, %v863_v10 }
0x1011   :  { %1494 = vpow2.f32 %v1363_v12 }
0x1015   :  { %v1493_v11 = vpop.eup %1492 }
0x1016   :  { %889 = vrot.lane.b32.xlu0 %v1493_v11, %s1568_s1 }
0x1017   :  { %v1495_v13 = vpop.eup %1494 }
0x1018   :  { %v867_v14 = vadd.f32 1.0, %v1495_v13 }
0x101a   :  { %1496 = vrcp.f32 %v867_v14  ;;  %v879_v20 = vand.u32 2147483648, %v867_v14  ;;  %vm873_vm2 = vweird.f32 %v867_v14  ;;  %v877_v21 = vand.u32 2147483647, %v867_v14 }
0x101c   :  { %v880_v24 = vor.u32 1.1754944e-38, %v879_v20  ;;  %vm878_vm1 = vcmp.eq.f32.partialorder %v877_v21, 8.507059e+37 }
0x1020   :  { %v1497_v15 = vpop.eup %1496 }
0x1021   :  { %v869_v16 = vmul.f32 %v1497_v15, %v867_v14  ;;  %vm874_vm15 = vweird.f32 %v1497_v15 }
0x1022   :  { %vm875_vm3 = vmor %vm873_vm2, %vm874_vm15  ;;  %vm107_vm2 = vcmask 1046528  }
0x1023   :  { %v870_v17 = vsub.f32 1.0, %v869_v16 }
0x1025   :  { %v871_v18 = vmul.f32 %v1497_v15, %v870_v17 }
0x1027   :  { %v872_v19 = vadd.f32 %v1497_v15, %v871_v18 }
0x1029   :  { %v876_v23 = vsel %vm875_vm3, %v1497_v15, %v872_v19  ;;  %vm189_vm3 = vcmask 1045504  }
0x102a   :  { %v881_v27 = vsel %vm878_vm1, %v880_v24, %v876_v23 }
0x102b   :  { %v887_v30 = vmul.f32 %v885_v29, %v881_v27 }
0x1088   :  { %v890_v25 = vpop.permute.xlu0 %889 }
0x1089   :  { %v892_v28 = vmul.f32 %v890_v25, %v881_v27 }
0x108b   :  { %894 = vrot.lane.b32.xlu1 %v892_v28, %s1569_s11 }
0x10fd   :  { %v895_v31 = vpop.permute.xlu1 %894 }
0x10fe   :  { %v897_v32 = vadd.f32 %v895_v31, %v887_v30 }
0x1100   :  { %1498 = vtanh.f32 %v897_v32  ;;  %v955_v12 = vrot.slane %v897_v32, 4 }
0x1106   :  { %v1499_v33 = vpop.eup %1498 }
0x1107   :  { %900 = vrot.lane.b32.xlu2 %v1499_v33, %s1570_s12 }
0x1161   :  { %v901_v34 = vpop.permute.xlu2 %900 }
0x1162   :  { %v903_v35 = vmul.f32 %v901_v34, %v881_v27 }
0x1164   :  { %917 = vperm.xlu2 %1417, %v903_v35   ;;  %911 = vperm.xlu1 %1427, %v903_v35  }
0x1165   :  { %906 = vperm.xlu0 %1425, %v903_v35  }
0x116d   :  { %1428 = vset.pattern.permute.xlu0 %v1571_v44 }
0x116e   :  { %923 = vperm.xlu0 %1428, %v903_v35  }
0x1176   :  { %1429 = vset.pattern.permute.xlu0 %v1573_v46 }
0x11be   :  { %v918_v41 = vpop.permute.xlu2 %917 }
0x11bf   :  { %v920_v43 = vmul.f32 %v918_v41, %v1634_v7 }
0x11d6   :  { %v912_v36 = vpop.permute.xlu1 %911 }
0x11d7   :  { %v907_v37 = vpop.permute.xlu0 %906  ;;  %v914_v38 = vmul.f32 %v912_v36, %v1632_v6 }
0x11d8   :  { %v909_v39 = vmul.f32 %v907_v37, %v1630_v5 }
0x11da   :  { %v915_v42 = vadd.f32 %v914_v38, %v909_v39 }
0x11dc   :  { %v921_v47 = vadd.f32 %v920_v43, %v915_v42 }
0x11e0   :  { %v924_v45 = vpop.permute.xlu0 %923 }
0x11e1   :  { %v926_v48 = vmul.f32 %v924_v45, %v1636_v8 }
0x11e3   :  { %v927_v50 = vadd.f32 %v926_v48, %v921_v47 }
0x11e5   :  { %v929_v51 = vrot.slane %v927_v50, 4 }
0x11e7   :  { %930 = vrot.lane.b32.xlu1 %v929_v51, %s1567_s10 }
0x1259   :  { %v931_v53 = vpop.permute.xlu1 %930 }
0x125a   :  { %v933_v54 = vadd.f32 %v931_v53, %v1759_v52 }
0x125c   :  { %1500 = vtanh.f32 %v933_v54  ;;  %v1364_v56 = vmul.f32 -1.442695, %v933_v54 }
0x125e   :  { %1502 = vpow2.f32 %v1364_v56 }
0x1262   :  { %v1501_v55 = vpop.eup %1500 }
0x1263   :  { %959 = vrot.lane.b32.xlu2 %v1501_v55, %s1568_s1 }
0x1264   :  { %v1503_v57 = vpop.eup %1502 }
0x1265   :  { %v937_v58 = vadd.f32 1.0, %v1503_v57 }
0x1267   :  { %1504 = vrcp.f32 %v937_v58  ;;  %v949_v1 = vand.u32 2147483648, %v937_v58  ;;  %vm943_vm5 = vweird.f32 %v937_v58  ;;  %v947_v2 = vand.u32 2147483647, %v937_v58 }
0x1269   :  { %v950_v4 = vor.u32 1.1754944e-38, %v949_v1  ;;  %vm948_vm7 = vcmp.eq.f32.partialorder %v947_v2, 8.507059e+37 }
0x126d   :  { %v1505_v59 = vpop.eup %1504 }
0x126e   :  { %v939_v60 = vmul.f32 %v1505_v59, %v937_v58  ;;  %vm944_vm4 = vweird.f32 %v1505_v59 }
0x126f   :  { %vm945_vm6 = vmor %vm943_vm5, %vm944_vm4 }
0x1270   :  { %v940_v61 = vsub.f32 1.0, %v939_v60 }
0x1272   :  { %v941_v62 = vmul.f32 %v1505_v59, %v940_v61 }
0x1274   :  { %v942_v63 = vadd.f32 %v1505_v59, %v941_v62 }
0x1276   :  { %v946_v3 = vsel %vm945_vm6, %v1505_v59, %v942_v63 }
0x1277   :  { %v951_v10 = vsel %vm948_vm7, %v950_v4, %v946_v3  ;;  %vm269_vm7 = vcmask 1044480  }
0x1278   :  { %v957_v13 = vmul.f32 %v955_v12, %v951_v10 }
0x12bd   :  { %v960_v9 = vpop.permute.xlu2 %959 }
0x12be   :  { %v962_v11 = vmul.f32 %v960_v9, %v951_v10 }
0x12c0   :  { %964 = vrot.lane.b32.xlu1 %v962_v11, %s1569_s11 }
0x1332   :  { %v965_v14 = vpop.permute.xlu1 %964 }
0x1333   :  { %v967_v15 = vadd.f32 %v965_v14, %v957_v13 }
0x1335   :  { %1506 = vtanh.f32 %v967_v15  ;;  %v1025_v55 = vrot.slane %v967_v15, 4  ;;  %v1783_v15 = vpop.f32.mrf.mxu3 }
0x133b   :  { %v1507_v16 = vpop.eup %1506 }
0x133c   :  { %970 = vrot.lane.b32.xlu2 %v1507_v16, %s1570_s12 }
0x1396   :  { %v971_v17 = vpop.permute.xlu2 %970 }
0x1397   :  { %v973_v18 = vmul.f32 %v971_v17, %v951_v10 }
0x1399   :  { %987 = vperm.xlu2 %1417, %v973_v18   ;;  %981 = vperm.xlu1 %1427, %v973_v18  }
0x139a   :  { %976 = vperm.xlu0 %1429, %v973_v18  }
0x13a1   :  { %1430 = vset.pattern.permute.xlu1 %v1571_v44 }
0x13a2   :  { %993 = vperm.xlu1 %1430, %v973_v18  }
0x13aa   :  { %1431 = vset.pattern.permute.xlu1 %v1574_v49 }
0x13f3   :  { %v988_v24 = vpop.permute.xlu2 %987 }
0x13f4   :  { %v990_v27 = vmul.f32 %v988_v24, %v1634_v7 }
0x140b   :  { %v982_v19 = vpop.permute.xlu1 %981 }
0x140c   :  { %v977_v20 = vpop.permute.xlu0 %976  ;;  %v984_v21 = vmul.f32 %v982_v19, %v1632_v6 }
0x140d   :  { %v979_v23 = vmul.f32 %v977_v20, %v1630_v5 }
0x140f   :  { %v985_v25 = vadd.f32 %v984_v21, %v979_v23 }
0x1411   :  { %v991_v29 = vadd.f32 %v990_v27, %v985_v25 }
0x1414   :  { %v994_v28 = vpop.permute.xlu1 %993 }
0x1415   :  { %v996_v30 = vmul.f32 %v994_v28, %v1636_v8 }
0x1417   :  { %v997_v31 = vadd.f32 %v996_v30, %v991_v29 }
0x1419   :  { %v999_v32 = vrot.slane %v997_v31, 4 }
0x141b   :  { %1000 = vrot.lane.b32.xlu2 %v999_v32, %s1567_s10 }
0x1475   :  { %v1001_v33 = vpop.permute.xlu2 %1000 }
0x1476   :  { %v1003_v49 = vadd.f32 %v1001_v33, %v1759_v52 }
0x1478   :  { %1508 = vtanh.f32 %v1003_v49  ;;  %v1365_v35 = vmul.f32 -1.442695, %v1003_v49 }
0x147a   :  { %1510 = vpow2.f32 %v1365_v35 }
0x147e   :  { %v1509_v34 = vpop.eup %1508 }
0x147f   :  { %1029 = vrot.lane.b32.xlu0 %v1509_v34, %s1568_s1 }
0x1480   :  { %v1511_v36 = vpop.eup %1510 }
0x1481   :  { %v1007_v37 = vadd.f32 1.0, %v1511_v36 }
0x1483   :  { %1512 = vrcp.f32 %v1007_v37  ;;  %v1019_v45 = vand.u32 2147483648, %v1007_v37  ;;  %vm1013_vm9 = vweird.f32 %v1007_v37  ;;  %v1017_v47 = vand.u32 2147483647, %v1007_v37 }
0x1485   :  { %v1020_v50 = vor.u32 1.1754944e-38, %v1019_v45  ;;  %vm1018_vm11 = vcmp.eq.f32.partialorder %v1017_v47, 8.507059e+37  ;;  %v111_v45 = vrot.slane %v1711_v0, 1 }
0x1489   :  { %v1513_v38 = vpop.eup %1512 }
0x148a   :  { %v1009_v39 = vmul.f32 %v1513_v38, %v1007_v37  ;;  %vm1014_vm8 = vweird.f32 %v1513_v38 }
0x148b   :  { %vm1015_vm10 = vmor %vm1013_vm9, %vm1014_vm8 }
0x148c   :  { %v1010_v41 = vsub.f32 1.0, %v1009_v39 }
0x148e   :  { %v1011_v42 = vmul.f32 %v1513_v38, %v1010_v41 }
0x1490   :  { %v1012_v43 = vadd.f32 %v1513_v38, %v1011_v42 }
0x1492   :  { %v1016_v48 = vsel %vm1015_vm10, %v1513_v38, %v1012_v43  ;;  %v109_v43 = vrot.slane %v1683_v40, 1 }
0x1493   :  { %v1021_v53 = vsel %vm1018_vm11, %v1020_v50, %v1016_v48  ;;  %v117_v48 = vrot.slane %v1783_v15, 1 }
0x1494   :  { %v1027_v56 = vmul.f32 %v1025_v55, %v1021_v53  ;;  %v112_v47 = vsel %vm107_vm2, %v109_v43, %v111_v45 }
0x14f1   :  { %v1030_v51 = vpop.permute.xlu0 %1029 }
0x14f2   :  { %v1032_v54 = vmul.f32 %v1030_v51, %v1021_v53  ;;  %v191_v51 = vrot.slane %v1683_v40, 2 }
0x14f4   :  { %1034 = vrot.lane.b32.xlu1 %v1032_v54, %s1569_s11 }
0x1566   :  { %v1035_v57 = vpop.permute.xlu1 %1034 }
0x1567   :  { %v1037_v58 = vadd.f32 %v1035_v57, %v1027_v56 }
0x1569   :  { %1514 = vtanh.f32 %v1037_v58  ;;  %v1095_v34 = vrot.slane %v1037_v58, 4 }
0x156f   :  { %v1515_v59 = vpop.eup %1514 }
0x1570   :  { %1040 = vrot.lane.b32.xlu2 %v1515_v59, %s1570_s12 }
0x15ca   :  { %v1041_v60 = vpop.permute.xlu2 %1040 }
0x15cb   :  { %v1043_v61 = vmul.f32 %v1041_v60, %v1021_v53  ;;  %v193_v53 = vrot.slane %v1711_v0, 2 }
0x15cd   :  { %1057 = vperm.xlu2 %1417, %v1043_v61   ;;  %1051 = vperm.xlu1 %1431, %v1043_v61   ;;  %v194_v54 = vsel %vm189_vm3, %v191_v51, %v193_v53 }
0x15ce   :  { %1046 = vperm.xlu0 %1429, %v1043_v61  }
0x15d6   :  { %1432 = vset.pattern.permute.xlu0 %v1571_v44 }
0x15d7   :  { %1063 = vperm.xlu0 %1432, %v1043_v61  }
0x15df   :  { %1433 = vset.pattern.permute.xlu0 %v1573_v46 }
0x1627   :  { %v1058_v3 = vpop.permute.xlu2 %1057 }
0x1628   :  { %v1060_v9 = vmul.f32 %v1058_v3, %v1634_v7 }
0x163f   :  { %v1052_v62 = vpop.permute.xlu1 %1051 }
0x1640   :  { %v1047_v63 = vpop.permute.xlu0 %1046  ;;  %v1054_v1 = vmul.f32 %v1052_v62, %v1632_v6 }
0x1641   :  { %v1049_v2 = vmul.f32 %v1047_v63, %v1630_v5 }
0x1643   :  { %v1055_v4 = vadd.f32 %v1054_v1, %v1049_v2 }
0x1645   :  { %v1061_v11 = vadd.f32 %v1060_v9, %v1055_v4  ;;  %v1368_v4 = vmul.f32 -1.442695, %v1783_v15 }
0x1649   :  { %v1064_v10 = vpop.permute.xlu0 %1063 }
0x164a   :  { %v1066_v12 = vmul.f32 %v1064_v10, %v1636_v8 }
0x164c   :  { %v1067_v13 = vadd.f32 %v1066_v12, %v1061_v11 }
0x164e   :  { %v1069_v14 = vrot.slane %v1067_v13, 4 }
0x1650   :  { %1070 = vrot.lane.b32.xlu1 %v1069_v14, %s1567_s10 }
0x16c2   :  { %v1071_v46 = vpop.permute.xlu1 %1070 }
0x16c3   :  { %v1073_v16 = vadd.f32 %v1071_v46, %v1783_v15 }
0x16c5   :  { %1516 = vtanh.f32 %v1073_v16  ;;  %v1366_v18 = vmul.f32 -1.442695, %v1073_v16 }
0x16c7   :  { %1518 = vpow2.f32 %v1366_v18 }
0x16cb   :  { %v1517_v17 = vpop.eup %1516 }
0x16cc   :  { %1099 = vrot.lane.b32.xlu2 %v1517_v17, %s1568_s1 }
0x16cd   :  { %v1519_v19 = vpop.eup %1518 }
0x16ce   :  { %v1077_v20 = vadd.f32 1.0, %v1519_v19 }
0x16d0   :  { %1520 = vrcp.f32 %v1077_v20  ;;  %v1089_v28 = vand.u32 2147483648, %v1077_v20  ;;  %vm1083_vm13 = vweird.f32 %v1077_v20  ;;  %v1087_v29 = vand.u32 2147483647, %v1077_v20 }
0x16d2   :  { %v1090_v31 = vor.u32 1.1754944e-38, %v1089_v28  ;;  %vm1088_vm15 = vcmp.eq.f32.partialorder %v1087_v29, 8.507059e+37  ;;  %v190_v28 = vrot.slane %v1654_v22, 2 }
0x16d4   :  { %v192_v29 = vsel %vm189_vm3, %v190_v28, %v191_v51 }
0x16d6   :  { %v1521_v21 = vpop.eup %1520 }
0x16d7   :  { %v1079_v23 = vmul.f32 %v1521_v21, %v1077_v20  ;;  %vm1084_vm12 = vweird.f32 %v1521_v21 }
0x16d8   :  { %vm1085_vm14 = vmor %vm1083_vm13, %vm1084_vm12  ;;  %vm143_vm12 = vcmask 64512   ;;  %vm145_vm13 = vcmask 59392  }
0x16d9   :  { %v1080_v24 = vsub.f32 1.0, %v1079_v23  ;;  %v108_v23 = vrot.slane %v1654_v22, 1 }
0x16db   :  { %v1081_v25 = vmul.f32 %v1521_v21, %v1080_v24  ;;  %v110_v24 = vsel %vm107_vm2, %v108_v23, %v109_v43 }
0x16dd   :  { %v1082_v27 = vadd.f32 %v1521_v21, %v1081_v25  ;;  %v113_v25 = vrot.slane %v1735_v26, 1 }
0x16df   :  { %v1086_v30 = vsel %vm1085_vm14, %v1521_v21, %v1082_v27  ;;  %vm1251_vm14 = vcmask 1043456  }
0x16e0   :  { %v1091_v33 = vsel %vm1088_vm15, %v1090_v31, %v1086_v30  ;;  %v195_v30 = vrot.slane %v1735_v26, 2  ;;  %v197_v31 = vrot.slane %v1759_v52, 2  ;;  %vm1247_vm15 = vcmask 72704  }
0x16e1   :  { %v1097_v35 = vmul.f32 %v1095_v34, %v1091_v33 }
0x1726   :  { %v1100_v32 = vpop.permute.xlu2 %1099 }
0x1727   :  { %v1102_v49 = vmul.f32 %v1100_v32, %v1091_v33  ;;  %v198_v32 = vsel %vm189_vm3, %v195_v30, %v197_v31 }
0x1729   :  { %1104 = vrot.lane.b32.xlu1 %v1102_v49, %s1569_s11  ;;  %v270_v49 = vrot.slane %v1654_v22, 3 }
0x179b   :  { %v1105_v36 = vpop.permute.xlu1 %1104 }
0x179c   :  { %v1788_v37 = vadd.f32 %v1105_v36, %v1097_v35  ;;  %v275_v35 = vrot.slane %v1735_v26, 3  ;;  %v277_v36 = vrot.slane %v1759_v52, 3 }
0x179e   :  { %1522 = vtanh.f32 %v1788_v37 }
0x179f   :  { %1524 = vtanh.f32 %v1783_v15 }
0x17a0   :  { %1526 = vpow2.f32 %v1368_v4 }
0x17a4   :  { %v1523_v38 = vpop.eup %1522 }
0x17a5   :  { %1110 = vrot.lane.b32.xlu2 %v1523_v38, %s1570_s12  ;;  %v1525_v42 = vpop.eup %1524  ;;  %v278_v38 = vsel %vm269_vm7, %v275_v35, %v277_v36 }
0x17a6   :  { %v1527_v9 = vpop.eup %1526 }
0x17a7   :  { %v1187_v10 = vadd.f32 1.0, %v1527_v9 }
0x17a9   :  { %1528 = vrcp.f32 %v1187_v10  ;;  %vm1193_vm1 = vweird.f32 %v1187_v10  ;;  %v1197_v46 = vand.u32 2147483647, %v1187_v10 }
0x17ab   :  { %vm1198_vm6 = vcmp.eq.f32.partialorder %v1197_v46, 8.507059e+37  ;;  %v196_v46 = vsel %vm189_vm3, %v193_v53, %v195_v30 }
0x17ff   :  { %v1111_v39 = vpop.permute.xlu2 %1110 }
0x1800   :  { %v1113_v41 = vmul.f32 %v1111_v39, %v1091_v33  ;;  %v271_v33 = vrot.slane %v1683_v40, 3 }
0x1802   :  { %1127 = vperm.xlu2 %1417, %v1113_v41   ;;  %1121 = vperm.xlu1 %1431, %v1113_v41   ;;  %v272_v34 = vsel %vm269_vm7, %v270_v49, %v271_v33 }
0x1803   :  { %1116 = vperm.xlu0 %1433, %v1113_v41  }
0x180a   :  { %1434 = vset.pattern.permute.xlu1 %v1571_v44 }
0x180b   :  { %1133 = vperm.xlu1 %1434, %v1113_v41   ;;  %1435 = vset.pattern.permute.xlu0 %v1571_v44  ;;  %v115_v44 = vrot.slane %v1759_v52, 1 }
0x180d   :  { %v118_v50 = vsel %vm107_vm2, %v115_v44, %v117_v48  ;;  %v116_v27 = vsel %vm107_vm2, %v113_v25, %v115_v44 }
0x1813   :  { %1206 = vrot.lane.b32.xlu1 %v1525_v42, %s1568_s1 }
0x181b   :  { %121 = vrot.lane.b32.xlu1 %v112_v47, %s1568_s1 }
0x1823   :  { %127 = vrot.lane.b32.xlu1 %v118_v50, %s1568_s1 }
0x182b   :  { %203 = vrot.lane.b32.xlu1 %v194_v54, %s1575_s0 }
0x185c   :  { %v1128_v59 = vpop.permute.xlu2 %1127 }
0x185d   :  { %v1130_v61 = vmul.f32 %v1128_v59, %v1634_v7 }
0x1874   :  { %v1122_v55 = vpop.permute.xlu1 %1121 }
0x1875   :  { %v1117_v56 = vpop.permute.xlu0 %1116  ;;  %v1124_v57 = vmul.f32 %v1122_v55, %v1632_v6  ;;  %v1529_v6 = vpop.eup %1528 }
0x1876   :  { %v1119_v58 = vmul.f32 %v1117_v56, %v1630_v5  ;;  %v1189_v5 = vmul.f32 %v1529_v6, %v1187_v10  ;;  %vm1194_vm4 = vweird.f32 %v1529_v6 }
0x1877   :  { %vm1195_vm5 = vmor %vm1193_vm1, %vm1194_vm4  ;;  %vm156_vm1 = vcmask 63488   ;;  %vm186_vm4 = vcmask 1042432  }
0x1878   :  { %v1125_v60 = vadd.f32 %v1124_v57, %v1119_v58  ;;  %v1190_v11 = vsub.f32 1.0, %v1189_v5 }
0x187a   :  { %v1131_v63 = vadd.f32 %v1130_v61, %v1125_v60  ;;  %v1191_v13 = vmul.f32 %v1529_v6, %v1190_v11  ;;  %v114_v11 = vsel %vm107_vm2, %v111_v45, %v113_v25  ;;  %vm154_vm2 = vcmask 64516  }
0x187c   :  { %v1192_v14 = vadd.f32 %v1529_v6, %v1191_v13  ;;  %v1577_v13 = vmov 65535  }
0x187d   :  { %v1134_v62 = vpop.permute.xlu1 %1133 }
0x187e   :  { %v1136_v1 = vmul.f32 %v1134_v62, %v1636_v8  ;;  %v1199_v8 = vand.u32 2147483648, %v1187_v10  ;;  %v1196_v18 = vsel %vm1195_vm5, %v1529_v6, %v1192_v14  ;;  %vm238_vm5 = vcmask 193664  }
0x1880   :  { %v1137_v2 = vadd.f32 %v1136_v1, %v1131_v63  ;;  %v1200_v17 = vor.u32 1.1754944e-38, %v1199_v8  ;;  %v1252_v8 = vsel %vm1251_vm14, 4294967295, %v1577_v13  ;;  %vm1229_vm14 = vcmask 31744  }
0x1881   :  { %v1253_v45 = vsel %vm269_vm7, %v1252_v8, 0 }
0x1882   :  { %v1139_v3 = vrot.slane %v1137_v2, 4  ;;  %v1822_v20 = vsel %vm1198_vm6, %v1200_v17, %v1196_v18  ;;  %v273_v17 = vrot.slane %v1711_v0, 3  ;;  %vm225_vm6 = vcmask 195712  }
0x1883   :  { %v1204_v61 = vmul.f32 0.0, %v1822_v20 }
0x1884   :  { %1140 = vrot.lane.b32.xlu2 %v1139_v3, %s1567_s10  ;;  %v276_v18 = vsel %vm269_vm7, %v273_v17, %v275_v35 }
0x1885   :  { %v1207_v19 = vpop.permute.xlu1 %1206 }
0x1886   :  { %v1209_v21 = vmul.f32 %v1207_v19, %v1822_v20  ;;  %v279_v19 = vrot.slane %v1783_v15, 3 }
0x188d   :  { %v122_v1 = vpop.permute.xlu1 %121 }
0x188e   :  { %v1861_v2 = vadd.f32 %v122_v1, %v1683_v40 }
0x1890   :  { %v146_v10 = vsel %vm145_vm13, %v1861_v2, -inf }
0x18de   :  { %v1141_v12 = vpop.permute.xlu2 %1140 }
0x18df   :  { %v1143_v7 = vadd.f32 %v1141_v12, %v1783_v15  ;;  %v1387_v12 = vld [vmem:[%s1990_s4] sm:$0x10] }
0x18e1   :  { %1530 = vtanh.f32 %v1143_v7  ;;  %v1367_v39 = vmul.f32 -1.442695, %v1143_v7 }
0x18e3   :  { %1532 = vpow2.f32 %v1367_v39 }
0x18e7   :  { %v1531_v16 = vpop.eup %1530 }
0x18e8   :  { %1169 = vrot.lane.b32.xlu0 %v1531_v16, %s1568_s1  ;;  %v199_v16 = vrot.slane %v1783_v15, 2 }
0x18e9   :  { %v1533_v41 = vpop.eup %1532 }
0x18ea   :  { %v1147_v42 = vadd.f32 1.0, %v1533_v41  ;;  %v200_v35 = vsel %vm189_vm3, %v197_v31, %v199_v16  ;;  %vm184_vm3 = vcmask 1041408  }
0x18ec   :  { %1534 = vrcp.f32 %v1147_v42  ;;  %v1159_v54 = vand.u32 2147483648, %v1147_v42  ;;  %vm1153_vm9 = vweird.f32 %v1147_v42  ;;  %v1157_v55 = vand.u32 2147483647, %v1147_v42 }
0x18ee   :  { %v1160_v57 = vor.u32 1.1754944e-38, %v1159_v54  ;;  %vm1158_vm11 = vcmp.eq.f32.partialorder %v1157_v55, 8.507059e+37 }
0x18f0   :  { %1211 = vrot.lane.b32.xlu0 %v1209_v21, %s1569_s11  ;;  %v1165_v21 = vrot.slane %v1788_v37, 4 }
0x18f2   :  { %v1535_v43 = vpop.eup %1534 }
0x18f3   :  { %v1149_v47 = vmul.f32 %v1535_v43, %v1147_v42  ;;  %vm1154_vm8 = vweird.f32 %v1535_v43 }
0x18f4   :  { %vm1155_vm10 = vmor %vm1153_vm9, %vm1154_vm8  ;;  %vm227_vm8 = vcmask 189568   ;;  %vm305_vm9 = vcmask 392512  }
0x18f5   :  { %v1150_v44 = vsub.f32 1.0, %v1149_v47  ;;  %v274_v47 = vsel %vm269_vm7, %v271_v33, %v273_v17  ;;  %v280_v33 = vsel %vm269_vm7, %v277_v36, %v279_v19  ;;  %vm236_vm7 = vcmask 195716  }
0x18f7   :  { %v1151_v50 = vmul.f32 %v1535_v43, %v1150_v44  ;;  %v155_v44 = vsel %vm154_vm2, %v1861_v2, -inf }
0x18f8   :  { %119 = vrot.lane.b32.xlu0 %v110_v24, %s1568_s1 }
0x18f9   :  { %v1152_v51 = vadd.f32 %v1535_v43, %v1151_v50 }
0x18fb   :  { %v1156_v56 = vsel %vm1155_vm10, %v1535_v43, %v1152_v51  ;;  %vm318_vm10 = vcmask 389440  }
0x18fc   :  { %v1855_v59 = vsel %vm1158_vm11, %v1160_v57, %v1156_v56  ;;  %vm307_vm11 = vcmask 385344  }
0x18fd   :  { %v1167_v53 = vmul.f32 %v1165_v21, %v1855_v59 }
0x1900   :  { %125 = vrot.lane.b32.xlu0 %v116_v27, %s1568_s1  ;;  %v128_v27 = vpop.permute.xlu1 %127 }
0x1901   :  { %v1908_v30 = vadd.f32 %v128_v27, %v1759_v52 }
0x1903   :  { %v166_v37 = vsel %vm145_vm13, %v1908_v30, -inf  ;;  %vm316_vm13 = vcmask 392516  }
0x1908   :  { %201 = vrot.lane.b32.xlu0 %v192_v29, %s1575_s0 }
0x1910   :  { %207 = vrot.lane.b32.xlu0 %v198_v32, %s1575_s0 }
0x1918   :  { %281 = vrot.lane.b32.xlu0 %v272_v34, %s1576_s15 }
0x1920   :  { %287 = vrot.lane.b32.xlu0 %v278_v38, %s1576_s15 }
0x195a   :  { %v1170_v58 = vpop.permute.xlu0 %1169 }
0x195b   :  { %v1172_v60 = vmul.f32 %v1170_v58, %v1855_v59 }
0x195d   :  { %1174 = vrot.lane.b32.xlu2 %v1172_v60, %s1569_s11 }
0x1962   :  { %v1212_v62 = vpop.permute.xlu0 %1211 }
0x1963   :  { %v1214_v63 = vadd.f32 %v1212_v62, %v1204_v61  ;;  %v174_v61 = vsel %vm154_vm2, %v1908_v30, -inf  ;;  %vm1302_vm2 = vcmask 261120  }
0x1965   :  { %1536 = vtanh.f32 %v1214_v63 }
0x196a   :  { %v120_v3 = vpop.permute.xlu0 %119 }
0x196b   :  { %v1537_v4 = vpop.eup %1536  ;;  %v1864_v9 = vadd.f32 %v120_v3, %v1654_v22  ;;  %v1371_v22 = vld [vmem:[%s1990_s4] sm:$0xf]  ;;  %s1579_s4 = smov 44  }
0x196c   :  { %1217 = vrot.lane.b32.xlu2 %v1537_v4, %s1570_s12  ;;  %v1372_v7 = vor.u32 %v1387_v12, %v1371_v22 }
0x196d   :  { %v144_v6 = vsel %vm143_vm12, %v1864_v9, -inf }
0x196e   :  { %v147_v5 = vmax.f32 %v144_v6, %v146_v10  ;;  %v1255_v14 = vand.u32 %v1372_v7, %v1253_v45 }
0x1970   :  { %1264 = vmatpush.bf16.msra.mxu1 %v1255_v14 }
0x1972   :  { %v126_v25 = vpop.permute.xlu0 %125 }
0x1973   :  { %v1904_v29 = vadd.f32 %v126_v25, %v1735_v26  ;;  %v148_v26 = vrot.slane %v147_v5, 4 }
0x1974   :  { %123 = vrot.lane.b32.xlu2 %v114_v11, %s1568_s1 }
0x1975   :  { %v165_v32 = vsel %vm143_vm12, %v1904_v29, -inf  ;;  %v149_v39 = vmax.f32 %v147_v5, %v148_v26 }
0x1976   :  { %v167_v34 = vmax.f32 %v165_v32, %v166_v37 }
0x1977   :  { %v150_v50 = vrot.slane %v149_v39, 2 }
0x1978   :  { %v168_v38 = vrot.slane %v167_v34, 4 }
0x1979   :  { %v151_v56 = vmax.f32 %v149_v39, %v150_v50 }
0x197a   :  { %v169_v42 = vmax.f32 %v167_v34, %v168_v38  ;;  %v202_v17 = vpop.permute.xlu0 %201 }
0x197b   :  { %v152_v63 = vrot.slane %v151_v56, 1 }
0x197c   :  { %129 = vrot.lane.b32.xlu2 %v117_v48, %s1568_s1  ;;  %v1239_v48 = vld [vmem:[%s1989_s3] sm:$0x3]  ;;  %v170_v54 = vrot.slane %v169_v42, 2  ;;  %s1578_s3 = smov 32  }
0x197d   :  { %1373 = vmatmul.msk.bf16.vlgmr.msra.gmra.mxu1 %vm1247_vm15, %v1239_v48  ;;  %v153_v5 = vmax.f32 %v151_v56, %v152_v63  ;;  %vm1237_vm15 = vcmask 195584  }
0x197e   :  { %v171_v60 = vmax.f32 %v169_v42, %v170_v54 }
0x1980   :  { %v172_v4 = vrot.slane %v171_v60, 1 }
0x1982   :  { %v173_v52 = vmax.f32 %v171_v60, %v172_v4  ;;  %v208_v32 = vpop.permute.xlu0 %207 }
0x1983   :  { %v222_v38 = vadd.f32 %v208_v32, %v1904_v29 }
0x1984   :  { %205 = vrot.lane.b32.xlu2 %v196_v46, %s1575_s0 }
0x1985   :  { %v247_v50 = vsel %vm225_vm6, %v222_v38, -inf }
0x198c   :  { %211 = vrot.lane.b32.xlu2 %v199_v16, %s1575_s0 }
0x1994   :  { %285 = vrot.lane.b32.xlu2 %v276_v18, %s1576_s15 }
0x199c   :  { %291 = vrot.lane.b32.xlu2 %v279_v19, %s1576_s15  ;;  %v219_v19 = vadd.f32 %v202_v17, %v1864_v9 }
0x19b7   :  { %v1175_v23 = vpop.permute.xlu2 %1174 }
0x19b8   :  { %v1177_v24 = vadd.f32 %v1175_v23, %v1167_v53  ;;  %v226_v23 = vsel %vm225_vm6, %v219_v19, -inf }
0x19ba   :  { %1538 = vtanh.f32 %v1177_v24 }
0x19c0   :  { %v1539_v28 = vpop.eup %1538 }
0x19c1   :  { %1180 = vrot.lane.b32.xlu1 %v1539_v28, %s1570_s12 }
0x19c6   :  { %v1218_v49 = vpop.permute.xlu2 %1217 }
0x19c7   :  { %v1220_v36 = vmul.f32 %v1218_v49, %v1822_v20  ;;  %v204_v20 = vpop.permute.xlu1 %203 }
0x19c8   :  { %v220_v21 = vadd.f32 %v204_v20, %v1861_v2 }
0x19c9   :  { %209 = vrot.lane.b32.xlu1 %v200_v35, %s1575_s0 }
0x19ca   :  { %v237_v24 = vsel %vm236_vm7, %v220_v21, -inf  ;;  %v228_v25 = vsel %vm227_vm8, %v220_v21, -inf }
0x19cb   :  { %v229_v28 = vmax.f32 %v226_v23, %v228_v25 }
0x19cd   :  { %v230_v2 = vrot.slane %v229_v28, 4 }
0x19ce   :  { %v124_v41 = vpop.permute.xlu2 %123 }
0x19cf   :  { %v139_v43 = vadd.f32 %v124_v41, %v1711_v0  ;;  %v231_v26 = vmax.f32 %v229_v28, %v230_v2  ;;  %v282_v41 = vpop.permute.xlu0 %281 }
0x19d1   :  { %v157_v31 = vsel %vm156_vm1, %v139_v43, -inf  ;;  %283 = vrot.lane.b32.xlu1 %v274_v47, %s1576_s15 }
0x19d2   :  { %v158_v51 = vmax.f32 %v155_v44, %v157_v31  ;;  %v232_v44 = vrot.slane %v231_v26, 2 }
0x19d4   :  { %v159_v55 = vrot.slane %v158_v51, 4  ;;  %v233_v29 = vmax.f32 %v231_v26, %v232_v44 }
0x19d6   :  { %v160_v57 = vmax.f32 %v158_v51, %v159_v55  ;;  %v130_v58 = vpop.permute.xlu2 %129 }
0x19d7   :  { %v142_v0 = vadd.f32 %v130_v58, %v1783_v15 }
0x19d8   :  { %v161_v40 = vrot.slane %v160_v57, 2 }
0x19d9   :  { %v175_v62 = vsel %vm156_vm1, %v142_v0, -inf  ;;  %289 = vrot.lane.b32.xlu1 %v280_v33, %s1576_s15 }
0x19da   :  { %v162_v1 = vmax.f32 %v160_v57, %v161_v40  ;;  %v176_v3 = vmax.f32 %v174_v61, %v175_v62 }
0x19dc   :  { %v163_v10 = vrot.slane %v162_v1, 1  ;;  %v177_v6 = vrot.slane %v176_v3, 4 }
0x19de   :  { %v164_v15 = vmax.f32 %v162_v1, %v163_v10  ;;  %v178_v11 = vmax.f32 %v176_v3, %v177_v6  ;;  %v206_v16 = vpop.permute.xlu2 %205  ;;  %v234_v1 = vrot.slane %v233_v29, 1  ;;  %v288_v3 = vpop.permute.xlu0 %287 }
0x19df   :  { %v221_v18 = vadd.f32 %v206_v16, %v139_v43 }
0x19e0   :  { %v179_v22 = vrot.slane %v178_v11, 2  ;;  %v183_v12 = vsel %vm71_vm0, %v153_v5, %v164_v15  ;;  %v235_v17 = vmax.f32 %v233_v29, %v234_v1 }
0x19e1   :  { %1226 = vrot.lane.b32.xlu1 %v1220_v36, %s1578_s3  ;;  %v185_v7 = vsel %vm184_vm3, %v183_v12, %v173_v52  ;;  %v239_v53 = vsel %vm238_vm5, %v221_v18, -inf }
0x19e2   :  { %v180_v13 = vmax.f32 %v178_v11, %v179_v22  ;;  %v240_v27 = vmax.f32 %v237_v24, %v239_v53 }
0x19e4   :  { %v181_v8 = vrot.slane %v180_v13, 1  ;;  %v241_v9 = vrot.slane %v240_v27, 4 }
0x19e6   :  { %v182_v45 = vmax.f32 %v180_v13, %v181_v8  ;;  %v212_v37 = vpop.permute.xlu2 %211  ;;  %v242_v35 = vmax.f32 %v240_v27, %v241_v9  ;;  %v302_v13 = vadd.f32 %v288_v3, %v222_v38 }
0x19e7   :  { %v224_v39 = vadd.f32 %v212_v37, %v142_v0  ;;  %v299_v0 = vadd.f32 %v282_v41, %v219_v19 }
0x19e8   :  { %v1938_v14 = vsel %vm186_vm4, %v185_v7, %v182_v45  ;;  %v243_v43 = vrot.slane %v242_v35, 2  ;;  %v327_v27 = vsel %vm305_vm9, %v302_v13, -inf }
0x19e9   :  { %v257_v51 = vsel %vm238_vm5, %v224_v39, -inf  ;;  %v306_v6 = vsel %vm305_vm9, %v299_v0, -inf }
0x19ea   :  { %v244_v57 = vmax.f32 %v242_v35, %v243_v43 }
0x19ec   :  { %v245_v62 = vrot.slane %v244_v57, 1 }
0x19ee   :  { %v286_v31 = vpop.permute.xlu2 %285  ;;  %v246_v8 = vmax.f32 %v244_v57, %v245_v62 }
0x19f0   :  { %v265_v25 = vsel %vm71_vm0, %v235_v17, %v246_v8  ;;  %v1287_v17 = vld [vmem:[%s1992_s6 + $0x10] sm:$0x1] }
0x19f6   :  { %v292_v52 = vpop.permute.xlu2 %291 }
0x19f7   :  { %v304_v20 = vadd.f32 %v292_v52, %v224_v39 }
0x19fa   :  { %v1266_v48 = vpop.f32.mrf.mxu1 }
0x19fb   :  { %1273 = vrot.lane.b32.xlu2 %v1266_v48, %s1578_s3 }
0x1a02   :  { %v1268_v46 = vpop.f32.mrf.mxu1 }
0x1a33   :  { %v1181_v49 = vpop.permute.xlu1 %1180 }
0x1a34   :  { %v1183_v34 = vmul.f32 %v1181_v49, %v1855_v59  ;;  %v337_v49 = vsel %vm318_vm10, %v304_v20, -inf  ;;  %v1288_v20 = vunpack.c.l.bf16 %v1287_v17 }
0x1a36   :  { %1222 = vrot.lane.b32.xlu0 %v1183_v34, %s1579_s4 }
0x1a3b   :  { %v210_v42 = vpop.permute.xlu1 %209 }
0x1a3c   :  { %v223_v47 = vadd.f32 %v210_v42, %v1908_v30  ;;  %v301_v30 = vadd.f32 %v286_v31, %v221_v18 }
0x1a3e   :  { %v248_v59 = vsel %vm227_vm8, %v223_v47, -inf  ;;  %v256_v54 = vsel %vm236_vm7, %v223_v47, -inf  ;;  %v319_v5 = vsel %vm318_vm10, %v301_v30, -inf  ;;  %v1270_v30 = vld [vmem:[%s1991_s5] sm:$0xf]  ;;  %s1581_s5 = smov 24  }
0x1a3f   :  { %v249_v55 = vmax.f32 %v247_v50, %v248_v59  ;;  %v258_v56 = vmax.f32 %v256_v54, %v257_v51 }
0x1a41   :  { %v250_v58 = vrot.slane %v249_v55, 4  ;;  %v259_v60 = vrot.slane %v258_v56, 4 }
0x1a43   :  { %v251_v40 = vmax.f32 %v249_v55, %v250_v58  ;;  %v260_v33 = vmax.f32 %v258_v56, %v259_v60  ;;  %v284_v61 = vpop.permute.xlu1 %283 }
0x1a44   :  { %v300_v63 = vadd.f32 %v284_v61, %v220_v21 }
0x1a45   :  { %v252_v4 = vrot.slane %v251_v40, 2  ;;  %v261_v10 = vrot.slane %v260_v33, 2 }
0x1a46   :  { %v308_v15 = vsel %vm307_vm11, %v300_v63, -inf  ;;  %v317_v11 = vsel %vm316_vm13, %v300_v63, -inf }
0x1a47   :  { %v253_v36 = vmax.f32 %v251_v40, %v252_v4  ;;  %v262_v22 = vmax.f32 %v260_v33, %v261_v10  ;;  %v309_v12 = vmax.f32 %v306_v6, %v308_v15  ;;  %v320_v7 = vmax.f32 %v317_v11, %v319_v5  ;;  %v1389_v15 = vld [vmem:[%s1992_s6 + $0x8] sm:$0xff]  ;;  %v1388_v11 = vld [vmem:[%s1992_s6] sm:$0xff] }
0x1a48   :  { %1312 = vmatpush.bf16.msra.mxu2 %v1389_v15 }
0x1a49   :  { %v254_v45 = vrot.slane %v253_v36, 1  ;;  %v310_v48 = vrot.slane %v309_v12, 4  ;;  %v321_v46 = vrot.slane %v320_v7, 4  ;;  %v263_v16 = vrot.slane %v262_v22, 1 }
0x1a4b   :  { %v311_v18 = vmax.f32 %v309_v12, %v310_v48  ;;  %v322_v19 = vmax.f32 %v320_v7, %v321_v46  ;;  %v290_v21 = vpop.permute.xlu1 %289  ;;  %v255_v53 = vmax.f32 %v253_v36, %v254_v45  ;;  %v264_v23 = vmax.f32 %v262_v22, %v263_v16 }
0x1a4c   :  { %v303_v24 = vadd.f32 %v290_v21, %v223_v47  ;;  %1313 = vmatpush.bf16.msra.mxu2 %v1388_v11  ;;  %v188_v36 = vmax.f32 %v1938_v14, 0.0  ;;  %v1289_v14 = vperm.slane %v1288_v20, 0 }
0x1a4d   :  { %v312_v28 = vrot.slane %v311_v18, 2  ;;  %v323_v32 = vrot.slane %v322_v19, 2  ;;  %v266_v37 = vsel %vm184_vm3, %v265_v25, %v255_v53 }
0x1a4e   :  { %v328_v9 = vsel %vm307_vm11, %v303_v24, -inf  ;;  %v336_v34 = vsel %vm316_vm13, %v303_v24, -inf  ;;  %v267_v2 = vsel %vm186_vm4, %v266_v37, %v264_v23 }
0x1a4f   :  { %v329_v35 = vmax.f32 %v327_v27, %v328_v9  ;;  %v338_v26 = vmax.f32 %v336_v34, %v337_v49  ;;  %v313_v38 = vmax.f32 %v311_v18, %v312_v28  ;;  %v324_v39 = vmax.f32 %v322_v19, %v323_v32 }
0x1a50   :  { %v268_v41 = vmax.f32 %v267_v2, 0.0 }
0x1a51   :  { %v330_v42 = vrot.slane %v329_v35, 4  ;;  %v339_v43 = vrot.slane %v338_v26, 4  ;;  %v314_v31 = vrot.slane %v313_v38, 1  ;;  %v325_v50 = vrot.slane %v324_v39, 1 }
0x1a52   :  { %350 = vrot.lane.b32.xlu0 %v268_v41, %s1568_s1  ;;  %s1328_s1 = sshll.u32 %s1993_s7, 4  ;;  %s1329_s1 = int_to_ptr.hbm [resolvable:$true] %s1328_s1 }
0x1a53   :  { %v331_v47 = vmax.f32 %v329_v35, %v330_v42  ;;  %v340_v44 = vmax.f32 %v338_v26, %v339_v43  ;;  %v315_v56 = vmax.f32 %v313_v38, %v314_v31  ;;  %v326_v57 = vmax.f32 %v324_v39, %v325_v50  ;;  %v1227_v3 = vpop.permute.xlu1 %1226 }
0x1a55   :  { %v332_v51 = vrot.slane %v331_v47, 2  ;;  %v341_v59 = vrot.slane %v340_v44, 2  ;;  %v345_v40 = vsel %vm71_vm0, %v315_v56, %v326_v57  ;;  %v1274_v61 = vpop.permute.xlu2 %1273  ;;  %vm358_vm0 = vcmask 130048  }
0x1a56   :  { %v1276_v63 = vmul.f32 %v1274_v61, %v1270_v30 }
0x1a57   :  { %v333_v54 = vmax.f32 %v331_v47, %v332_v51  ;;  %v342_v55 = vmax.f32 %v340_v44, %v341_v59 }
0x1a59   :  { %v334_v29 = vrot.slane %v333_v54, 1  ;;  %v343_v58 = vrot.slane %v342_v55, 1 }
0x1a5a   :  { %1278 = vrot.lane.b32.xlu0 %v1276_v63, %s1580_s24 }
0x1a5b   :  { %v335_v60 = vmax.f32 %v333_v54, %v334_v29  ;;  %v344_v0 = vmax.f32 %v342_v55, %v343_v58 }
0x1a5d   :  { %v346_v33 = vsel %vm184_vm3, %v345_v40, %v335_v60 }
0x1a5e   :  { %v347_v62 = vsel %vm186_vm4, %v346_v33, %v344_v0 }
0x1a5f   :  { %v348_v1 = vmax.f32 %v347_v62, 0.0 }
0x1a61   :  { %354 = vrot.lane.b32.xlu1 %v348_v1, %s1576_s15 }
0x1aa8   :  { %v1223_v4 = vpop.permute.xlu0 %1222 }
0x1aa9   :  { %v1230_v10 = vsel %vm1229_vm14, %v1223_v4, %v1227_v3 }
0x1aaa   :  { %v1231_v6 = vmax.f32 %v1230_v10, 0.0 }
0x1aac   :  { %v1233_v5 = vrot.slane %v1231_v6, 4 }
0x1aae   :  { %1234 = vrot.lane.b32.xlu2 %v1233_v5, %s1581_s5 }
0x1ac4   :  { %v351_v52 = vpop.permute.xlu0 %350 }
0x1ac5   :  { %v357_v12 = vsel %vm143_vm12, %v188_v36, %v351_v52  ;;  %vm1319_vm12 = vcmask 19456  }
0x1acc   :  { %v1279_v45 = vpop.permute.xlu0 %1278 }
0x1ad3   :  { %v355_v22 = vpop.permute.xlu1 %354 }
0x1ad4   :  { %v359_v7 = vsel %vm358_vm0, %v357_v12, %v355_v22 }
0x1b08   :  { %v1235_v13 = vpop.permute.xlu2 %1234 }
0x1b09   :  { %v1238_v8 = vsel %vm1237_vm15, %v359_v7, %v1235_v13 }
0x1b0a   :  { %v1271_v48 = vmul.f32 %v1270_v30, %v1238_v8 }
0x1b0c   :  { %v1281_v46 = vadd.f32 %v1279_v45, %v1271_v48 }
0x1b0e   :  { %v1282_v16 = vpack.c.bf16 %v1281_v46, %v1281_v46 }
0x1b10   :  { %1382 = vmatmul.msk.bf16.vlgmr.msra.gmra.mxu2 %vm1302_vm2, %v1282_v16 }
0x1b93   :  { %v1315_v18 = vpop.f32.mrf.mxu2 }
0x1b94   :  { %v1316_v19 = vadd.f32 %v1315_v18, %v1289_v14 }
0x1b96   :  { %1320 = vst.msk [vmem:[#allocation2] sm:$0xf] %vm1319_vm12, %v1316_v19 }
0x1b97   :  { %1331 = dma.vmem_to_hbm [thread:$0]  %s1327_s8, 64, %s1329_s1, [#allocation3]  }
0x1b9b   :  { %v1317_v21 = vpop.f32.mrf.mxu2 }
0x1b9c   :  { %1564 = dma.done.wait [#allocation3], 64  }
0x1b9d   :  { %1565 = vsyncadd [#allocation3], 4294967232 }
0x1b9e   :  { %1336 = vsyncpa [#allocation3], 1 }

</bundles_post_ra>
